<compile_context>
chip_gen: v6e
topology: v6e:2x2x1
jax: 0.10.0
libtpu: 0.0.40
codegen_flags: <defaults>
</compile_context>

<pallas_src>
import math

import jax
import jax.numpy as jnp
from jax.experimental import pallas as pl
from jax.experimental.pallas import tpu as pltpu


# ----------------------------- Pallas kernel -------------------------------

def _conv_bn_relu_kernel(w_ref, a_ref, b_ref, g_ref, beta_ref, o_ref):
    """Fused  o = BN(relu(W @ A + b))  for one full block.

    w:    (Cout, K)        flattened conv weight
    a:    (K, M)           im2col patches, M = B*Ho*Wo in lanes
    b/g/beta: (Cout, 1)    conv bias, BN gamma, BN beta
    o:    (Cout, M)
    BatchNorm uses batch statistics (training-mode), biased variance, eps=1e-5.
    """
    y = jnp.dot(w_ref[...], a_ref[...], preferred_element_type=jnp.float32)
    y = jnp.maximum(y + b_ref[...], 0.0)                     # bias + ReLU

    m = y.shape[1]                                           # static
    inv_m = 1.0 / float(m)
    mean = jnp.sum(y, axis=1, keepdims=True) * inv_m         # (Cout, 1)
    ctr = y - mean
    var = jnp.sum(ctr * ctr, axis=1, keepdims=True) * inv_m  # biased variance
    inv_std = jax.lax.rsqrt(var + 1e-5)
    o_ref[...] = ctr * (inv_std * g_ref[...]) + beta_ref[...]


def fused_conv_bn_relu(w_mat, patches_t, bias, gamma, beta):
    """w_mat: (Cout, K), patches_t: (K, M), bias/gamma/beta: (Cout, 1) -> (Cout, M)."""
    cout, k = w_mat.shape
    k2, m = patches_t.shape
    assert k == k2
    full2d = lambda i: (0, 0)
    return pl.pallas_call(
        _conv_bn_relu_kernel,
        out_shape=jax.ShapeDtypeStruct((cout, m), jnp.float32),
        grid=(1,),
        in_specs=[
            pl.BlockSpec((cout, k), full2d),
            pl.BlockSpec((k, m), full2d),
            pl.BlockSpec((cout, 1), full2d),
            pl.BlockSpec((cout, 1), full2d),
            pl.BlockSpec((cout, 1), full2d),
        ],
        out_specs=pl.BlockSpec((cout, m), full2d),
        compiler_params=pltpu.CompilerParams(
            dimension_semantics=("arbitrary",)),
    )(w_mat, patches_t, bias, gamma, beta)


# ------------------------------- model glue --------------------------------

def conv_bn_relu_block(img, w, b, gamma, beta):
    """Conv2d(k=3, stride=2, pad=1) -> ReLU -> BatchNorm2d (batch stats). NCHW."""
    B, C, H, W = img.shape
    Cout = w.shape[0]
    Ho = (H + 2 - 3) // 2 + 1
    Wo = (W + 2 - 3) // 2 + 1

    # TODO(synk): patch extraction (im2col) stays in XLA; folding the strided
    # 3x3/stride-2 gather into the kernel's index_map is not expressible with
    # rectangular BlockSpecs and would need manual strided DMA.
    xp = jnp.pad(img, ((0, 0), (0, 0), (1, 1), (1, 1)))
    taps = []
    for ki in range(3):
        for kj in range(3):
            taps.append(xp[:, :, ki:ki + 2 * Ho - 1:2, kj:kj + 2 * Wo - 1:2])
    patches = jnp.stack(taps, axis=2)                         # (B, C, 9, Ho, Wo)
    # Rows ordered (c, tap) to match w.reshape(Cout, C*9); cols ordered (b, ho, wo).
    patches_t = patches.transpose(1, 2, 0, 3, 4).reshape(C * 9, B * Ho * Wo)
    w_mat = w.reshape(Cout, C * 9)

    y = fused_conv_bn_relu(w_mat, patches_t,
                           b.reshape(Cout, 1),
                           gamma.reshape(Cout, 1),
                           beta.reshape(Cout, 1))             # (Cout, B*Ho*Wo)
    return y.reshape(Cout, B, Ho, Wo).transpose(1, 0, 2, 3)   # NCHW


def conv_input_model(params, img):
    """Forward pass of ConvInputModel.

    conv1 -> ReLU -> BN1; the extra conv2..conv4 stack only exists when the
    model was built with nb_input_channels == 3 and only runs when H > 16,
    exactly as in the PyTorch module.
    """
    # TODO(synk): BatchNorm running-mean/var buffer updates are not reproduced;
    # normalization uses batch statistics (PyTorch training-mode forward).
    x = conv_bn_relu_block(img, params["conv1_w"], params["conv1_b"],
                           params["bn1_gamma"], params["bn1_beta"])
    if "conv2_w" in params and img.shape[2] > 16:
        for i in (2, 3, 4):
            x = conv_bn_relu_block(x, params[f"conv{i}_w"], params[f"conv{i}_b"],
                                   params[f"bn{i}_gamma"], params[f"bn{i}_beta"])
    return x


def init_params(key, nb_input_channels=512):
    ks = jax.random.split(key, 4)

    def conv_init(k, cout, cin):
        bound = 1.0 / math.sqrt(cin * 9)
        kw, kb = jax.random.split(k)
        w = jax.random.uniform(kw, (cout, cin, 3, 3), jnp.float32, -bound, bound)
        b = jax.random.uniform(kb, (cout,), jnp.float32, -bound, bound)
        return w, b

    p = {}
    p["conv1_w"], p["conv1_b"] = conv_init(ks[0], 24, nb_input_channels)
    p["bn1_gamma"] = jnp.ones((24,), jnp.float32)
    p["bn1_beta"] = jnp.zeros((24,), jnp.float32)
    if nb_input_channels == 3:
        for j, i in enumerate((2, 3, 4), start=1):
            p[f"conv{i}_w"], p[f"conv{i}_b"] = conv_init(ks[j], 24, 24)
            p[f"bn{i}_gamma"] = jnp.ones((24,), jnp.float32)
            p[f"bn{i}_beta"] = jnp.zeros((24,), jnp.float32)
    return p


if __name__ == "__main__":
    key = jax.random.PRNGKey(0)
    kp, kx = jax.random.split(key)

    params = init_params(kp, nb_input_channels=512)           # module default
    B = 2
    img = jax.random.normal(kx, (B, 512, 16, 16), jnp.float32)  # NCHW

    fwd = jax.jit(conv_input_model)
    out = fwd(params, img)
    jax.block_until_ready(out)

    assert out.shape == (B, 24, 8, 8), out.shape
    assert bool(jnp.all(jnp.isfinite(out)))
    print("KERNEL_OK")
</pallas_src>

<mosaic_0001>
module attributes {stable_mosaic.version = 11 : i64} {
  func.func @_conv_bn_relu_kernel(%arg0: i32, %arg1: memref<24x4608xf32, #tpu.memory_space<vmem>>, %arg2: memref<4608x128xf32, #tpu.memory_space<vmem>>, %arg3: memref<24x1xf32, #tpu.memory_space<vmem>>, %arg4: memref<24x1xf32, #tpu.memory_space<vmem>>, %arg5: memref<24x1xf32, #tpu.memory_space<vmem>>, %arg6: memref<24x128xf32, #tpu.memory_space<vmem>>) attributes {dimension_semantics = [#tpu.dimension_semantics<arbitrary>], iteration_bounds = array<i64: 1>, scalar_prefetch = 0 : i64, scratch_operands = 0 : i64, tpu.core_type = #tpu.core_type<tc>, window_params = [{pipeline_mode = #tpu.pipeline_mode<synchronous>, transform_indices = @transform_0, window_bounds = array<i64: 24, 4608>}, {pipeline_mode = #tpu.pipeline_mode<synchronous>, transform_indices = @transform_1, window_bounds = array<i64: 4608, 128>}, {pipeline_mode = #tpu.pipeline_mode<synchronous>, transform_indices = @transform_2, window_bounds = array<i64: 24, 1>}, {pipeline_mode = #tpu.pipeline_mode<synchronous>, transform_indices = @transform_3, window_bounds = array<i64: 24, 1>}, {pipeline_mode = #tpu.pipeline_mode<synchronous>, transform_indices = @transform_4, window_bounds = array<i64: 24, 1>}, {pipeline_mode = #tpu.pipeline_mode<synchronous>, transform_indices = @transform_5, window_bounds = array<i64: 24, 128>}]} {
    %c0 = arith.constant 0 : index
    %c0_0 = arith.constant 0 : index
    %0 = vector.load %arg1[%c0, %c0_0] : memref<24x4608xf32, #tpu.memory_space<vmem>>, vector<24x4608xf32>
    %c0_1 = arith.constant 0 : index
    %c0_2 = arith.constant 0 : index
    %1 = vector.load %arg2[%c0_1, %c0_2] : memref<4608x128xf32, #tpu.memory_space<vmem>>, vector<4608x128xf32>
    %cst = arith.constant dense<0.000000e+00> : vector<24x128xf32>
    %2 = tpu.matmul %0, %1, %cst {dimension_numbers = #tpu.dot_dimension_numbers<[1], [0], [0], [1], [0, 0, 1, 1], [], []>} : vector<24x4608xf32>, vector<4608x128xf32>, vector<24x128xf32> -> vector<24x128xf32>
    %c0_3 = arith.constant 0 : index
    %c0_4 = arith.constant 0 : index
    %3 = vector.load %arg3[%c0_3, %c0_4] : memref<24x1xf32, #tpu.memory_space<vmem>>, vector<24x1xf32>
    %4 = vector.broadcast %3 : vector<24x1xf32> to vector<24x128xf32>
    %5 = arith.addf %2, %4 : vector<24x128xf32>
    %cst_5 = arith.constant 0.000000e+00 : f32
    %6 = vector.broadcast %cst_5 : f32 to vector<24x128xf32>
    %7 = arith.maximumf %5, %6 : vector<24x128xf32>
    %cst_6 = arith.constant dense<0.000000e+00> : vector<24xf32>
    %8 = vector.multi_reduction <add>, %7, %cst_6 [1] : vector<24x128xf32> to vector<24xf32>
    %9 = vector.shape_cast %8 : vector<24xf32> to vector<24x1xf32>
    %cst_7 = arith.constant 7.812500e-03 : f32
    %10 = vector.broadcast %cst_7 : f32 to vector<24x1xf32>
    %11 = arith.mulf %9, %10 : vector<24x1xf32>
    %12 = vector.broadcast %11 : vector<24x1xf32> to vector<24x128xf32>
    %13 = arith.subf %7, %12 : vector<24x128xf32>
    %14 = arith.mulf %13, %13 : vector<24x128xf32>
    %cst_8 = arith.constant dense<0.000000e+00> : vector<24xf32>
    %15 = vector.multi_reduction <add>, %14, %cst_8 [1] : vector<24x128xf32> to vector<24xf32>
    %16 = vector.shape_cast %15 : vector<24xf32> to vector<24x1xf32>
    %cst_9 = arith.constant 7.812500e-03 : f32
    %17 = vector.broadcast %cst_9 : f32 to vector<24x1xf32>
    %18 = arith.mulf %16, %17 : vector<24x1xf32>
    %cst_10 = arith.constant 9.99999974E-6 : f32
    %19 = vector.broadcast %cst_10 : f32 to vector<24x1xf32>
    %20 = arith.addf %18, %19 : vector<24x1xf32>
    %21 = math.rsqrt %20 : vector<24x1xf32>
    %c0_11 = arith.constant 0 : index
    %c0_12 = arith.constant 0 : index
    %22 = vector.load %arg4[%c0_11, %c0_12] : memref<24x1xf32, #tpu.memory_space<vmem>>, vector<24x1xf32>
    %23 = arith.mulf %21, %22 : vector<24x1xf32>
    %24 = vector.broadcast %23 : vector<24x1xf32> to vector<24x128xf32>
    %25 = arith.mulf %13, %24 : vector<24x128xf32>
    %c0_13 = arith.constant 0 : index
    %c0_14 = arith.constant 0 : index
    %26 = vector.load %arg5[%c0_13, %c0_14] : memref<24x1xf32, #tpu.memory_space<vmem>>, vector<24x1xf32>
    %27 = vector.broadcast %26 : vector<24x1xf32> to vector<24x128xf32>
    %28 = arith.addf %25, %27 : vector<24x128xf32>
    %c0_15 = arith.constant 0 : index
    %c0_16 = arith.constant 0 : index
    %29 = vector.load %arg6[%c0_15, %c0_16] : memref<24x128xf32, #tpu.memory_space<vmem>>, vector<24x128xf32>
    tpu.vector_store %arg6[%c0_15, %c0_16], %28 {strides = array<i32>} : memref<24x128xf32, #tpu.memory_space<vmem>>, vector<24x128xf32>,
    return
  }
  func.func @transform_0(%arg0: i32) -> (i32, i32) {
    %c0_i32 = arith.constant 0 : i32
    %c0_i32_0 = arith.constant 0 : i32
    %c0_i32_1 = arith.constant 0 : i32
    return %c0_i32, %c0_i32_0 : i32, i32
  }
  func.func @transform_1(%arg0: i32) -> (i32, i32) {
    %c0_i32 = arith.constant 0 : i32
    %c0_i32_0 = arith.constant 0 : i32
    %c0_i32_1 = arith.constant 0 : i32
    return %c0_i32, %c0_i32_0 : i32, i32
  }
  func.func @transform_2(%arg0: i32) -> (i32, i32) {
    %c0_i32 = arith.constant 0 : i32
    %c0_i32_0 = arith.constant 0 : i32
    %c0_i32_1 = arith.constant 0 : i32
    return %c0_i32, %c0_i32_0 : i32, i32
  }
  func.func @transform_3(%arg0: i32) -> (i32, i32) {
    %c0_i32 = arith.constant 0 : i32
    %c0_i32_0 = arith.constant 0 : i32
    %c0_i32_1 = arith.constant 0 : i32
    return %c0_i32, %c0_i32_0 : i32, i32
  }
  func.func @transform_4(%arg0: i32) -> (i32, i32) {
    %c0_i32 = arith.constant 0 : i32
    %c0_i32_0 = arith.constant 0 : i32
    %c0_i32_1 = arith.constant 0 : i32
    return %c0_i32, %c0_i32_0 : i32, i32
  }
  func.func @transform_5(%arg0: i32) -> (i32, i32) {
    %c0_i32 = arith.constant 0 : i32
    %c0_i32_0 = arith.constant 0 : i32
    %c0_i32_1 = arith.constant 0 : i32
    return %c0_i32, %c0_i32_0 : i32, i32
  }
}

</mosaic_0001>

<bundles_post_ra>
// kernel: conv_input_model.1
= control target key start
LH: loop header
LB: loop body
LE: loop exit
PB: predicated region body
PF: predicated region fallthrough
CT: control target
= control target key end

     0   :  { %v2994_v3 = vmov 0   ;;  %s5305_s1 = inlined_call_operand.vmem [shape: f32[4608,128], index: 1, kind: input, shape index: {}]   ;;  %s5306_s0 = inlined_call_operand.vmem [shape: f32[24,4608], index: 0, kind: input, shape index: {}]   ;;  %s5307_s2 = inlined_call_operand.vmem [shape: f32[24,1], index: 2, kind: input, shape index: {}]   ;;  %s5308_s4 = inlined_call_operand.vmem [shape: f32[24,1], index: 4, kind: input, shape index: {}]   ;;  %s5309_s3 = inlined_call_operand.vmem [shape: f32[24,1], index: 3, kind: input, shape index: {}]   ;;  %s5310_s5 = inlined_call_operand.vmem [shape: f32[24,128], index: 5, kind: output, shape index: {}]  }
   0x1   :  { %v159_v0 = vld [vmem:[%s5305_s1 + $0xf8] sm:$0xff]  ;;  %2986 = vset.pattern.permute.xlu0 %v2994_v3  ;;  %2987 = vset.pattern.permute.xlu1 %v2994_v3  ;;  %v158_v5 = vld [vmem:[%s5305_s1 + $0xf0] sm:$0xff]  ;;  %v157_v9 = vld [vmem:[%s5305_s1 + $0xe8] sm:$0xff] }
   0x2   :  { %v191_v1 = vld [vmem:[%s5305_s1 + $0x1f8] sm:$0xff]  ;;  %2247 = vmatprep.subr.mxu0 %v159_v0  ;;  %v190_v6 = vld [vmem:[%s5305_s1 + $0x1f0] sm:$0xff]  ;;  %v189_v10 = vld [vmem:[%s5305_s1 + $0x1e8] sm:$0xff] }
   0x3   :  { %v143_v2 = vld [vmem:[%s5305_s1 + $0x78] sm:$0xff]  ;;  %2288 = vmatprep.subr.mxu1 %v191_v1  ;;  %v142_v7 = vld [vmem:[%s5305_s1 + $0x70] sm:$0xff]  ;;  %v141_v11 = vld [vmem:[%s5305_s1 + $0x68] sm:$0xff] }
   0x4   :  { %v175_v4 = vld [vmem:[%s5305_s1 + $0x178] sm:$0xff]  ;;  %2248 = vmatpush3.msra.mxu0 %v143_v2  ;;  %v174_v8 = vld [vmem:[%s5305_s1 + $0x170] sm:$0xff]  ;;  %v173_v12 = vld [vmem:[%s5305_s1 + $0x168] sm:$0xff] }
   0x5   :  { %2289 = vmatpush3.msra.mxu1 %v175_v4  ;;  %2249 = vmatprep.subr.mxu0 %v158_v5  ;;  %v156_v13 = vld [vmem:[%s5305_s1 + $0xe0] sm:$0xff]  ;;  %v155_v17 = vld [vmem:[%s5305_s1 + $0xd8] sm:$0xff]  ;;  %v154_v21 = vld [vmem:[%s5305_s1 + $0xd0] sm:$0xff] }
   0x6   :  { %2290 = vmatprep.subr.mxu1 %v190_v6  ;;  %2250 = vmatpush3.msra.mxu0 %v142_v7  ;;  %v188_v14 = vld [vmem:[%s5305_s1 + $0x1e0] sm:$0xff]  ;;  %v187_v18 = vld [vmem:[%s5305_s1 + $0x1d8] sm:$0xff]  ;;  %v186_v22 = vld [vmem:[%s5305_s1 + $0x1d0] sm:$0xff] }
   0x7   :  { %2291 = vmatpush3.msra.mxu1 %v174_v8  ;;  %2251 = vmatprep.subr.mxu0 %v157_v9  ;;  %v140_v15 = vld [vmem:[%s5305_s1 + $0x60] sm:$0xff]  ;;  %v139_v19 = vld [vmem:[%s5305_s1 + $0x58] sm:$0xff]  ;;  %v138_v23 = vld [vmem:[%s5305_s1 + $0x50] sm:$0xff] }
   0x8   :  { %2292 = vmatprep.subr.mxu1 %v189_v10  ;;  %v172_v16 = vld [vmem:[%s5305_s1 + $0x160] sm:$0xff]  ;;  %2252 = vmatpush3.msra.mxu0 %v141_v11  ;;  %v171_v20 = vld [vmem:[%s5305_s1 + $0x158] sm:$0xff]  ;;  %v170_v24 = vld [vmem:[%s5305_s1 + $0x150] sm:$0xff] }
   0x9   :  { %2293 = vmatpush3.msra.mxu1 %v173_v12  ;;  %2253 = vmatprep.subr.mxu0 %v156_v13  ;;  %v153_v25 = vld [vmem:[%s5305_s1 + $0xc8] sm:$0xff]  ;;  %v152_v29 = vld [vmem:[%s5305_s1 + $0xc0] sm:$0xff]  ;;  %v151_v33 = vld [vmem:[%s5305_s1 + $0xb8] sm:$0xff] }
   0xa   :  { %2294 = vmatprep.subr.mxu1 %v188_v14  ;;  %2254 = vmatpush3.msra.mxu0 %v140_v15  ;;  %v185_v26 = vld [vmem:[%s5305_s1 + $0x1c8] sm:$0xff]  ;;  %v184_v30 = vld [vmem:[%s5305_s1 + $0x1c0] sm:$0xff]  ;;  %v183_v34 = vld [vmem:[%s5305_s1 + $0x1b8] sm:$0xff] }
   0xb   :  { %2295 = vmatpush3.msra.mxu1 %v172_v16  ;;  %2255 = vmatprep.subr.mxu0 %v155_v17  ;;  %v137_v27 = vld [vmem:[%s5305_s1 + $0x48] sm:$0xff]  ;;  %v136_v31 = vld [vmem:[%s5305_s1 + $0x40] sm:$0xff]  ;;  %v135_v35 = vld [vmem:[%s5305_s1 + $0x38] sm:$0xff] }
   0xc   :  { %2296 = vmatprep.subr.mxu1 %v187_v18  ;;  %2256 = vmatpush3.msra.mxu0 %v139_v19  ;;  %v169_v28 = vld [vmem:[%s5305_s1 + $0x148] sm:$0xff]  ;;  %v168_v32 = vld [vmem:[%s5305_s1 + $0x140] sm:$0xff]  ;;  %v167_v36 = vld [vmem:[%s5305_s1 + $0x138] sm:$0xff] }
   0xd   :  { %2297 = vmatpush3.msra.mxu1 %v171_v20  ;;  %2257 = vmatprep.subr.mxu0 %v154_v21  ;;  %v150_v37 = vld [vmem:[%s5305_s1 + $0xb0] sm:$0xff]  ;;  %v149_v41 = vld [vmem:[%s5305_s1 + $0xa8] sm:$0xff]  ;;  %v148_v45 = vld [vmem:[%s5305_s1 + $0xa0] sm:$0xff] }
   0xe   :  { %2298 = vmatprep.subr.mxu1 %v186_v22  ;;  %2258 = vmatpush3.msra.mxu0 %v138_v23  ;;  %v182_v38 = vld [vmem:[%s5305_s1 + $0x1b0] sm:$0xff]  ;;  %v181_v42 = vld [vmem:[%s5305_s1 + $0x1a8] sm:$0xff]  ;;  %v180_v46 = vld [vmem:[%s5305_s1 + $0x1a0] sm:$0xff] }
   0xf   :  { %2299 = vmatpush3.msra.mxu1 %v170_v24  ;;  %2259 = vmatprep.subr.mxu0 %v153_v25  ;;  %v134_v39 = vld [vmem:[%s5305_s1 + $0x30] sm:$0xff]  ;;  %v133_v43 = vld [vmem:[%s5305_s1 + $0x28] sm:$0xff]  ;;  %v132_v47 = vld [vmem:[%s5305_s1 + $0x20] sm:$0xff] }
  0x10   :  { %2300 = vmatprep.subr.mxu1 %v185_v26  ;;  %2260 = vmatpush3.msra.mxu0 %v137_v27  ;;  %v166_v40 = vld [vmem:[%s5305_s1 + $0x130] sm:$0xff]  ;;  %v165_v44 = vld [vmem:[%s5305_s1 + $0x128] sm:$0xff]  ;;  %v164_v48 = vld [vmem:[%s5305_s1 + $0x120] sm:$0xff] }
  0x11   :  { %2301 = vmatpush3.msra.mxu1 %v169_v28  ;;  %2261 = vmatprep.subr.mxu0 %v152_v29  ;;  %v147_v49 = vld [vmem:[%s5305_s1 + $0x98] sm:$0xff]  ;;  %v146_v53 = vld [vmem:[%s5305_s1 + $0x90] sm:$0xff]  ;;  %v145_v57 = vld [vmem:[%s5305_s1 + $0x88] sm:$0xff] }
  0x12   :  { %2302 = vmatprep.subr.mxu1 %v184_v30  ;;  %2262 = vmatpush3.msra.mxu0 %v136_v31  ;;  %v179_v50 = vld [vmem:[%s5305_s1 + $0x198] sm:$0xff]  ;;  %v178_v54 = vld [vmem:[%s5305_s1 + $0x190] sm:$0xff]  ;;  %v177_v58 = vld [vmem:[%s5305_s1 + $0x188] sm:$0xff] }
  0x13   :  { %2303 = vmatpush3.msra.mxu1 %v168_v32  ;;  %2263 = vmatprep.subr.mxu0 %v151_v33  ;;  %v131_v51 = vld [vmem:[%s5305_s1 + $0x18] sm:$0xff]  ;;  %v130_v55 = vld [vmem:[%s5305_s1 + $0x10] sm:$0xff]  ;;  %v129_v59 = vld [vmem:[%s5305_s1 + $0x8] sm:$0xff] }
  0x14   :  { %2304 = vmatprep.subr.mxu1 %v183_v34  ;;  %2264 = vmatpush3.msra.mxu0 %v135_v35  ;;  %v163_v52 = vld [vmem:[%s5305_s1 + $0x118] sm:$0xff]  ;;  %v162_v56 = vld [vmem:[%s5305_s1 + $0x110] sm:$0xff]  ;;  %v161_v60 = vld [vmem:[%s5305_s1 + $0x108] sm:$0xff] }
  0x15   :  { %2305 = vmatpush3.msra.mxu1 %v167_v36  ;;  %2265 = vmatprep.subr.mxu0 %v150_v37  ;;  %v144_v61 = vld [vmem:[%s5305_s1 + $0x80] sm:$0xff]  ;;  %v21_v0 = vld [vmem:[%s5306_s0 + $0x8] sm:$0xff]  ;;  %v23_v3 = vld [vmem:[%s5306_s0 + $0x18] sm:$0xff] }
  0x16   :  { %2306 = vmatprep.subr.mxu1 %v182_v38  ;;  %2266 = vmatpush3.msra.mxu0 %v134_v39  ;;  %v176_v62 = vld [vmem:[%s5305_s1 + $0x180] sm:$0xff]  ;;  %v223_v4 = vld [vmem:[%s5305_s1 + $0x2f8] sm:$0xff]  ;;  %v22_v6 = vld [vmem:[%s5306_s0 + $0x10] sm:$0xff] }
  0x17   :  { %2307 = vmatpush3.msra.mxu1 %v166_v40  ;;  %2267 = vmatprep.subr.mxu0 %v149_v41  ;;  %v128_v63 = vld [vmem:[%s5305_s1] sm:$0xff]  ;;  %v255_v5 = vld [vmem:[%s5305_s1 + $0x3f8] sm:$0xff]  ;;  %v222_v9 = vld [vmem:[%s5305_s1 + $0x2f0] sm:$0xff] }
  0x18   :  { %2308 = vmatprep.subr.mxu1 %v181_v42  ;;  %2268 = vmatpush3.msra.mxu0 %v133_v43  ;;  %v160_v1 = vld [vmem:[%s5305_s1 + $0x100] sm:$0xff]  ;;  %v207_v7 = vld [vmem:[%s5305_s1 + $0x278] sm:$0xff]  ;;  %v254_v10 = vld [vmem:[%s5305_s1 + $0x3f0] sm:$0xff] }
  0x19   :  { %2309 = vmatpush3.msra.mxu1 %v165_v44  ;;  %2269 = vmatprep.subr.mxu0 %v148_v45  ;;  %v20_v2 = vld [vmem:[%s5306_s0] sm:$0xff]  ;;  %v239_v8 = vld [vmem:[%s5305_s1 + $0x378] sm:$0xff]  ;;  %v206_v11 = vld [vmem:[%s5305_s1 + $0x270] sm:$0xff] }
  0x1a   :  { %2310 = vmatprep.subr.mxu1 %v180_v46  ;;  %2270 = vmatpush3.msra.mxu0 %v132_v47  ;;  %v238_v12 = vld [vmem:[%s5305_s1 + $0x370] sm:$0xff]  ;;  %v221_v13 = vld [vmem:[%s5305_s1 + $0x2e8] sm:$0xff]  ;;  %v220_v17 = vld [vmem:[%s5305_s1 + $0x2e0] sm:$0xff] }
  0x1b   :  { %2311 = vmatpush3.msra.mxu1 %v164_v48  ;;  %2271 = vmatprep.subr.mxu0 %v147_v49  ;;  %v253_v14 = vld [vmem:[%s5305_s1 + $0x3e8] sm:$0xff]  ;;  %v252_v18 = vld [vmem:[%s5305_s1 + $0x3e0] sm:$0xff]  ;;  %v219_v21 = vld [vmem:[%s5305_s1 + $0x2d8] sm:$0xff] }
  0x1c   :  { %2312 = vmatprep.subr.mxu1 %v179_v50  ;;  %2272 = vmatpush3.msra.mxu0 %v131_v51  ;;  %v205_v15 = vld [vmem:[%s5305_s1 + $0x268] sm:$0xff]  ;;  %v204_v19 = vld [vmem:[%s5305_s1 + $0x260] sm:$0xff]  ;;  %v251_v22 = vld [vmem:[%s5305_s1 + $0x3d8] sm:$0xff] }
  0x1d   :  { %2313 = vmatpush3.msra.mxu1 %v163_v52  ;;  %2273 = vmatprep.subr.mxu0 %v146_v53  ;;  %v237_v16 = vld [vmem:[%s5305_s1 + $0x368] sm:$0xff]  ;;  %v236_v20 = vld [vmem:[%s5305_s1 + $0x360] sm:$0xff]  ;;  %v203_v23 = vld [vmem:[%s5305_s1 + $0x258] sm:$0xff] }
  0x1e   :  { %2314 = vmatprep.subr.mxu1 %v178_v54  ;;  %2274 = vmatpush3.msra.mxu0 %v130_v55  ;;  %v235_v24 = vld [vmem:[%s5305_s1 + $0x358] sm:$0xff]  ;;  %v218_v25 = vld [vmem:[%s5305_s1 + $0x2d0] sm:$0xff]  ;;  %v217_v29 = vld [vmem:[%s5305_s1 + $0x2c8] sm:$0xff] }
  0x1f   :  { %2315 = vmatpush3.msra.mxu1 %v162_v56  ;;  %2275 = vmatprep.subr.mxu0 %v145_v57  ;;  %v250_v26 = vld [vmem:[%s5305_s1 + $0x3d0] sm:$0xff]  ;;  %v249_v30 = vld [vmem:[%s5305_s1 + $0x3c8] sm:$0xff]  ;;  %v216_v33 = vld [vmem:[%s5305_s1 + $0x2c0] sm:$0xff] }
  0x20   :  { %2316 = vmatprep.subr.mxu1 %v177_v58  ;;  %2276 = vmatpush3.msra.mxu0 %v129_v59  ;;  %v202_v27 = vld [vmem:[%s5305_s1 + $0x250] sm:$0xff]  ;;  %v201_v31 = vld [vmem:[%s5305_s1 + $0x248] sm:$0xff]  ;;  %v248_v34 = vld [vmem:[%s5305_s1 + $0x3c0] sm:$0xff] }
  0x21   :  { %2317 = vmatpush3.msra.mxu1 %v161_v60  ;;  %2277 = vmatprep.subr.mxu0 %v144_v61  ;;  %v234_v28 = vld [vmem:[%s5305_s1 + $0x350] sm:$0xff]  ;;  %v233_v32 = vld [vmem:[%s5305_s1 + $0x348] sm:$0xff]  ;;  %v200_v35 = vld [vmem:[%s5305_s1 + $0x240] sm:$0xff] }
  0x22   :  { %2318 = vmatprep.subr.mxu1 %v176_v62  ;;  %2278 = vmatpush3.msra.mxu0 %v128_v63  ;;  %v232_v36 = vld [vmem:[%s5305_s1 + $0x340] sm:$0xff]  ;;  %v215_v37 = vld [vmem:[%s5305_s1 + $0x2b8] sm:$0xff]  ;;  %v214_v41 = vld [vmem:[%s5305_s1 + $0x2b0] sm:$0xff] }
  0x23   :  { %786 = vmatprep.mubr.f32.mxu0 %v21_v0  ;;  %2319 = vmatpush3.msra.mxu1 %v160_v1  ;;  %v247_v38 = vld [vmem:[%s5305_s1 + $0x3b8] sm:$0xff]  ;;  %v246_v42 = vld [vmem:[%s5305_s1 + $0x3b0] sm:$0xff]  ;;  %v213_v45 = vld [vmem:[%s5305_s1 + $0x2a8] sm:$0xff] }
  0x24   :  { %787 = vmatmul.mubr.f32.vlgmr.msra.gmra.mxu0 %v20_v2  ;;  %866 = vmatprep.mubr.f32.mxu1 %v23_v3  ;;  %v199_v39 = vld [vmem:[%s5305_s1 + $0x238] sm:$0xff]  ;;  %v198_v43 = vld [vmem:[%s5305_s1 + $0x230] sm:$0xff]  ;;  %v245_v46 = vld [vmem:[%s5305_s1 + $0x3a8] sm:$0xff] }
  0x25   :  { %2329 = vmatprep.subr.mxu0 %v223_v4  ;;  %2370 = vmatprep.subr.mxu1 %v255_v5  ;;  %v231_v40 = vld [vmem:[%s5305_s1 + $0x338] sm:$0xff]  ;;  %v230_v44 = vld [vmem:[%s5305_s1 + $0x330] sm:$0xff]  ;;  %v197_v47 = vld [vmem:[%s5305_s1 + $0x228] sm:$0xff] }
  0x26   :  { %867 = vmatmul.mubr.f32.vlgmr.msra.gmra.mxu1 %v22_v6  ;;  %2330 = vmatpush3.msra.mxu0 %v207_v7  ;;  %v229_v48 = vld [vmem:[%s5305_s1 + $0x328] sm:$0xff]  ;;  %v212_v50 = vld [vmem:[%s5305_s1 + $0x2a0] sm:$0xff]  ;;  %v59_v55 = vld [vmem:[%s5306_s0 + $0x138] sm:$0xff] }
  0x27   :  { %2371 = vmatpush3.msra.mxu1 %v239_v8  ;;  %2331 = vmatprep.subr.mxu0 %v222_v9  ;;  %v57_v49 = vld [vmem:[%s5306_s0 + $0x128] sm:$0xff]  ;;  %v244_v51 = vld [vmem:[%s5305_s1 + $0x3a0] sm:$0xff]  ;;  %v211_v56 = vld [vmem:[%s5305_s1 + $0x298] sm:$0xff] }
  0x28   :  { %2372 = vmatprep.subr.mxu1 %v254_v10  ;;  %2332 = vmatpush3.msra.mxu0 %v206_v11  ;;  %v56_v52 = vld [vmem:[%s5306_s0 + $0x120] sm:$0xff]  ;;  %v243_v57 = vld [vmem:[%s5305_s1 + $0x398] sm:$0xff]  ;;  %v58_v58 = vld [vmem:[%s5306_s0 + $0x130] sm:$0xff] }
  0x29   :  { %2373 = vmatpush3.msra.mxu1 %v238_v12  ;;  %2333 = vmatprep.subr.mxu0 %v221_v13  ;;  %v196_v53 = vld [vmem:[%s5305_s1 + $0x220] sm:$0xff]  ;;  %v195_v59 = vld [vmem:[%s5305_s1 + $0x218] sm:$0xff]  ;;  %v93_v61 = vld [vmem:[%s5306_s0 + $0x248] sm:$0xff] }
  0x2a   :  { %2374 = vmatprep.subr.mxu1 %v253_v14  ;;  %2334 = vmatpush3.msra.mxu0 %v205_v15  ;;  %v228_v54 = vld [vmem:[%s5305_s1 + $0x320] sm:$0xff]  ;;  %v227_v60 = vld [vmem:[%s5305_s1 + $0x318] sm:$0xff]  ;;  %v210_v62 = vld [vmem:[%s5305_s1 + $0x290] sm:$0xff] }
  0x2b   :  { %2375 = vmatpush3.msra.mxu1 %v237_v16  ;;  %2335 = vmatprep.subr.mxu0 %v220_v17  ;;  %v242_v63 = vld [vmem:[%s5305_s1 + $0x390] sm:$0xff]  ;;  %v92_v0 = vld [vmem:[%s5306_s0 + $0x240] sm:$0xff]  ;;  %v95_v3 = vld [vmem:[%s5306_s0 + $0x258] sm:$0xff] }
  0x2c   :  { %2376 = vmatprep.subr.mxu1 %v252_v18  ;;  %2336 = vmatpush3.msra.mxu0 %v204_v19  ;;  %v194_v1 = vld [vmem:[%s5305_s1 + $0x210] sm:$0xff]  ;;  %v209_v4 = vld [vmem:[%s5305_s1 + $0x288] sm:$0xff]  ;;  %v208_v9 = vld [vmem:[%s5305_s1 + $0x280] sm:$0xff] }
  0x2d   :  { %2377 = vmatpush3.msra.mxu1 %v236_v20  ;;  %2337 = vmatprep.subr.mxu0 %v219_v21  ;;  %v226_v2 = vld [vmem:[%s5305_s1 + $0x310] sm:$0xff]  ;;  %v241_v5 = vld [vmem:[%s5305_s1 + $0x388] sm:$0xff]  ;;  %v240_v10 = vld [vmem:[%s5305_s1 + $0x380] sm:$0xff] }
  0x2e   :  { %2378 = vmatprep.subr.mxu1 %v251_v22  ;;  %2338 = vmatpush3.msra.mxu0 %v203_v23  ;;  %v94_v6 = vld [vmem:[%s5306_s0 + $0x250] sm:$0xff]  ;;  %v193_v7 = vld [vmem:[%s5305_s1 + $0x208] sm:$0xff]  ;;  %v192_v11 = vld [vmem:[%s5305_s1 + $0x200] sm:$0xff] }
  0x2f   :  { %2379 = vmatpush3.msra.mxu1 %v235_v24  ;;  %2339 = vmatprep.subr.mxu0 %v218_v25  ;;  %v225_v8 = vld [vmem:[%s5305_s1 + $0x308] sm:$0xff]  ;;  %v224_v13 = vld [vmem:[%s5305_s1 + $0x300] sm:$0xff]  ;;  %v27_v15 = vld [vmem:[%s5306_s0 + $0x38] sm:$0xff] }
  0x30   :  { %2380 = vmatprep.subr.mxu1 %v250_v26  ;;  %2340 = vmatpush3.msra.mxu0 %v202_v27  ;;  %v25_v12 = vld [vmem:[%s5306_s0 + $0x28] sm:$0xff]  ;;  %v24_v14 = vld [vmem:[%s5306_s0 + $0x20] sm:$0xff]  ;;  %v287_v16 = vld [vmem:[%s5305_s1 + $0x4f8] sm:$0xff] }
  0x31   :  { %2381 = vmatpush3.msra.mxu1 %v234_v28  ;;  %2341 = vmatprep.subr.mxu0 %v217_v29  ;;  %v319_v17 = vld [vmem:[%s5305_s1 + $0x5f8] sm:$0xff]  ;;  %v26_v18 = vld [vmem:[%s5306_s0 + $0x30] sm:$0xff]  ;;  %v61_v23 = vld [vmem:[%s5306_s0 + $0x148] sm:$0xff] }
  0x32   :  { %2382 = vmatprep.subr.mxu1 %v249_v30  ;;  %2342 = vmatpush3.msra.mxu0 %v201_v31  ;;  %v271_v19 = vld [vmem:[%s5305_s1 + $0x478] sm:$0xff]  ;;  %v286_v21 = vld [vmem:[%s5305_s1 + $0x4f0] sm:$0xff]  ;;  %v60_v26 = vld [vmem:[%s5306_s0 + $0x140] sm:$0xff] }
  0x33   :  { %2383 = vmatpush3.msra.mxu1 %v233_v32  ;;  %2343 = vmatprep.subr.mxu0 %v216_v33  ;;  %v303_v20 = vld [vmem:[%s5305_s1 + $0x578] sm:$0xff]  ;;  %v318_v22 = vld [vmem:[%s5305_s1 + $0x5f0] sm:$0xff]  ;;  %v285_v27 = vld [vmem:[%s5305_s1 + $0x4e8] sm:$0xff] }
  0x34   :  { %2384 = vmatprep.subr.mxu1 %v248_v34  ;;  %2344 = vmatpush3.msra.mxu0 %v200_v35  ;;  %v270_v24 = vld [vmem:[%s5305_s1 + $0x470] sm:$0xff]  ;;  %v317_v28 = vld [vmem:[%s5305_s1 + $0x5e8] sm:$0xff]  ;;  %v63_v29 = vld [vmem:[%s5306_s0 + $0x158] sm:$0xff] }
  0x35   :  { %2385 = vmatpush3.msra.mxu1 %v232_v36  ;;  %2345 = vmatprep.subr.mxu0 %v215_v37  ;;  %v302_v25 = vld [vmem:[%s5305_s1 + $0x570] sm:$0xff]  ;;  %v269_v30 = vld [vmem:[%s5305_s1 + $0x468] sm:$0xff]  ;;  %v284_v32 = vld [vmem:[%s5305_s1 + $0x4e0] sm:$0xff] }
  0x36   :  { %2386 = vmatprep.subr.mxu1 %v247_v38  ;;  %2346 = vmatpush3.msra.mxu0 %v199_v39  ;;  %v301_v31 = vld [vmem:[%s5305_s1 + $0x568] sm:$0xff]  ;;  %v62_v33 = vld [vmem:[%s5306_s0 + $0x150] sm:$0xff]  ;;  %v316_v34 = vld [vmem:[%s5305_s1 + $0x5e0] sm:$0xff] }
  0x37   :  { %2387 = vmatpush3.msra.mxu1 %v231_v40  ;;  %2347 = vmatprep.subr.mxu0 %v214_v41  ;;  %v97_v35 = vld [vmem:[%s5306_s0 + $0x268] sm:$0xff]  ;;  %v268_v36 = vld [vmem:[%s5305_s1 + $0x460] sm:$0xff]  ;;  %v283_v39 = vld [vmem:[%s5305_s1 + $0x4d8] sm:$0xff] }
  0x38   :  { %2388 = vmatprep.subr.mxu1 %v246_v42  ;;  %2348 = vmatpush3.msra.mxu0 %v198_v43  ;;  %v300_v37 = vld [vmem:[%s5305_s1 + $0x560] sm:$0xff]  ;;  %v315_v40 = vld [vmem:[%s5305_s1 + $0x5d8] sm:$0xff] }
  0x39   :  { %2389 = vmatpush3.msra.mxu1 %v230_v44  ;;  %2349 = vmatprep.subr.mxu0 %v213_v45  ;;  %v96_v38 = vld [vmem:[%s5306_s0 + $0x260] sm:$0xff]  ;;  %v99_v41 = vld [vmem:[%s5306_s0 + $0x278] sm:$0xff]  ;;  %v282_v44 = vld [vmem:[%s5305_s1 + $0x4d0] sm:$0xff] }
  0x3a   :  { %2390 = vmatprep.subr.mxu1 %v245_v46  ;;  %2350 = vmatpush3.msra.mxu0 %v197_v47  ;;  %v267_v42 = vld [vmem:[%s5305_s1 + $0x458] sm:$0xff]  ;;  %v98_v45 = vld [vmem:[%s5306_s0 + $0x270] sm:$0xff] }
  0x3b   :  { %2391 = vmatpush3.msra.mxu1 %v229_v48  ;;  %791 = vmatprep.mubr.f32.mxu0 %v57_v49  ;;  %v299_v43 = vld [vmem:[%s5305_s1 + $0x558] sm:$0xff]  ;;  %v314_v46 = vld [vmem:[%s5305_s1 + $0x5d0] sm:$0xff]  ;;  %v281_v49 = vld [vmem:[%s5305_s1 + $0x4c8] sm:$0xff] }
  0x3c   :  { %2351 = vmatprep.subr.mxu0 %v212_v50  ;;  %2392 = vmatprep.subr.mxu1 %v244_v51  ;;  %v266_v47 = vld [vmem:[%s5305_s1 + $0x450] sm:$0xff]  ;;  %v313_v50 = vld [vmem:[%s5305_s1 + $0x5c8] sm:$0xff] }
  0x3d   :  { %792 = vmatmul.mubr.f32.gmra.mxu0 %v56_v52  ;;  %2393 = vmatpush3.msra.mxu1 %v228_v54  ;;  %v298_v48 = vld [vmem:[%s5305_s1 + $0x550] sm:$0xff]  ;;  %v265_v51 = vld [vmem:[%s5305_s1 + $0x448] sm:$0xff]  ;;  %v312_v54 = vld [vmem:[%s5305_s1 + $0x5c0] sm:$0xff] }
  0x3e   :  { %2352 = vmatpush3.msra.mxu0 %v196_v53  ;;  %871 = vmatprep.mubr.f32.mxu1 %v59_v55  ;;  %v297_v52 = vld [vmem:[%s5305_s1 + $0x548] sm:$0xff]  ;;  %v280_v53 = vld [vmem:[%s5305_s1 + $0x4c0] sm:$0xff] }
  0x3f   :  { %2353 = vmatprep.subr.mxu0 %v211_v56  ;;  %2394 = vmatprep.subr.mxu1 %v243_v57  ;;  %v264_v55 = vld [vmem:[%s5305_s1 + $0x440] sm:$0xff]  ;;  %v279_v57 = vld [vmem:[%s5305_s1 + $0x4b8] sm:$0xff] }
  0x40   :  { %872 = vmatmul.mubr.f32.gmra.mxu1 %v58_v58  ;;  %2354 = vmatpush3.msra.mxu0 %v195_v59  ;;  %v296_v56 = vld [vmem:[%s5305_s1 + $0x540] sm:$0xff]  ;;  %v311_v58 = vld [vmem:[%s5305_s1 + $0x5b8] sm:$0xff] }
  0x41   :  { %2395 = vmatpush3.msra.mxu1 %v227_v60  ;;  %796 = vmatprep.mubr.f32.mxu0 %v93_v61  ;;  %v263_v59 = vld [vmem:[%s5305_s1 + $0x438] sm:$0xff]  ;;  %v278_v61 = vld [vmem:[%s5305_s1 + $0x4b0] sm:$0xff] }
  0x42   :  { %2355 = vmatprep.subr.mxu0 %v210_v62  ;;  %2396 = vmatprep.subr.mxu1 %v242_v63  ;;  %v295_v60 = vld [vmem:[%s5305_s1 + $0x538] sm:$0xff]  ;;  %v310_v62 = vld [vmem:[%s5305_s1 + $0x5b0] sm:$0xff] }
  0x43   :  { %797 = vmatmul.mubr.f32.gmra.mxu0 %v92_v0  ;;  %2397 = vmatpush3.msra.mxu1 %v226_v2  ;;  %v262_v63 = vld [vmem:[%s5305_s1 + $0x430] sm:$0xff]  ;;  %v309_v2 = vld [vmem:[%s5305_s1 + $0x5a8] sm:$0xff] }
  0x44   :  { %2356 = vmatpush3.msra.mxu0 %v194_v1  ;;  %876 = vmatprep.mubr.f32.mxu1 %v95_v3  ;;  %v294_v0 = vld [vmem:[%s5305_s1 + $0x530] sm:$0xff]  ;;  %v277_v1 = vld [vmem:[%s5305_s1 + $0x4a8] sm:$0xff] }
  0x45   :  { %2357 = vmatprep.subr.mxu0 %v209_v4  ;;  %2398 = vmatprep.subr.mxu1 %v241_v5  ;;  %v261_v3 = vld [vmem:[%s5305_s1 + $0x428] sm:$0xff]  ;;  %v276_v5 = vld [vmem:[%s5305_s1 + $0x4a0] sm:$0xff] }
  0x46   :  { %877 = vmatmul.mubr.f32.gmra.mxu1 %v94_v6  ;;  %2358 = vmatpush3.msra.mxu0 %v193_v7  ;;  %v293_v4 = vld [vmem:[%s5305_s1 + $0x528] sm:$0xff]  ;;  %v308_v6 = vld [vmem:[%s5305_s1 + $0x5a0] sm:$0xff] }
  0x47   :  { %2399 = vmatpush3.msra.mxu1 %v225_v8  ;;  %2359 = vmatprep.subr.mxu0 %v208_v9  ;;  %v260_v7 = vld [vmem:[%s5305_s1 + $0x420] sm:$0xff]  ;;  %v275_v9 = vld [vmem:[%s5305_s1 + $0x498] sm:$0xff] }
  0x48   :  { %2400 = vmatprep.subr.mxu1 %v240_v10  ;;  %2360 = vmatpush3.msra.mxu0 %v192_v11  ;;  %v292_v8 = vld [vmem:[%s5305_s1 + $0x520] sm:$0xff]  ;;  %v307_v10 = vld [vmem:[%s5305_s1 + $0x598] sm:$0xff] }
  0x49   :  { %946 = vmatprep.mubr.f32.mxu0 %v25_v12  ;;  %2401 = vmatpush3.msra.mxu1 %v224_v13  ;;  %v259_v11 = vld [vmem:[%s5305_s1 + $0x418] sm:$0xff]  ;;  %v274_v13 = vld [vmem:[%s5305_s1 + $0x490] sm:$0xff] }
  0x4a   :  { %947 = vmatmul.mubr.f32.vlgmr.msra.gmra.mxu0 %v24_v14  ;;  %1026 = vmatprep.mubr.f32.mxu1 %v27_v15  ;;  %v291_v12 = vld [vmem:[%s5305_s1 + $0x518] sm:$0xff]  ;;  %v306_v14 = vld [vmem:[%s5305_s1 + $0x590] sm:$0xff] }
  0x4b   :  { %2411 = vmatprep.subr.mxu0 %v287_v16  ;;  %2452 = vmatprep.subr.mxu1 %v319_v17  ;;  %v258_v15 = vld [vmem:[%s5305_s1 + $0x410] sm:$0xff]  ;;  %v273_v17 = vld [vmem:[%s5305_s1 + $0x488] sm:$0xff] }
  0x4c   :  { %1027 = vmatmul.mubr.f32.vlgmr.msra.gmra.mxu1 %v26_v18  ;;  %2412 = vmatpush3.msra.mxu0 %v271_v19  ;;  %v290_v16 = vld [vmem:[%s5305_s1 + $0x510] sm:$0xff]  ;;  %v305_v18 = vld [vmem:[%s5305_s1 + $0x588] sm:$0xff] }
  0x4d   :  { %2453 = vmatpush3.msra.mxu1 %v303_v20  ;;  %2413 = vmatprep.subr.mxu0 %v286_v21  ;;  %v257_v19 = vld [vmem:[%s5305_s1 + $0x408] sm:$0xff]  ;;  %v272_v21 = vld [vmem:[%s5305_s1 + $0x480] sm:$0xff] }
  0x4e   :  { %2454 = vmatprep.subr.mxu1 %v318_v22  ;;  %951 = vmatprep.mubr.f32.mxu0 %v61_v23  ;;  %v289_v20 = vld [vmem:[%s5305_s1 + $0x508] sm:$0xff]  ;;  %v304_v22 = vld [vmem:[%s5305_s1 + $0x580] sm:$0xff] }
  0x4f   :  { %2414 = vmatpush3.msra.mxu0 %v270_v24  ;;  %2455 = vmatpush3.msra.mxu1 %v302_v25  ;;  %v256_v23 = vld [vmem:[%s5305_s1 + $0x400] sm:$0xff]  ;;  %v29_v24 = vld [vmem:[%s5306_s0 + $0x48] sm:$0xff] }
  0x50   :  { %952 = vmatmul.mubr.f32.gmra.mxu0 %v60_v26  ;;  %2415 = vmatprep.subr.mxu0 %v285_v27  ;;  %v288_v25 = vld [vmem:[%s5305_s1 + $0x500] sm:$0xff]  ;;  %v31_v27 = vld [vmem:[%s5306_s0 + $0x58] sm:$0xff] }
  0x51   :  { %2456 = vmatprep.subr.mxu1 %v317_v28  ;;  %1031 = vmatprep.mubr.f32.mxu1 %v63_v29  ;;  %v28_v26 = vld [vmem:[%s5306_s0 + $0x40] sm:$0xff]  ;;  %v351_v28 = vld [vmem:[%s5305_s1 + $0x6f8] sm:$0xff] }
  0x52   :  { %2416 = vmatpush3.msra.mxu0 %v269_v30  ;;  %2457 = vmatpush3.msra.mxu1 %v301_v31  ;;  %v383_v29 = vld [vmem:[%s5305_s1 + $0x7f8] sm:$0xff]  ;;  %v30_v30 = vld [vmem:[%s5306_s0 + $0x50] sm:$0xff] }
  0x53   :  { %2417 = vmatprep.subr.mxu0 %v284_v32  ;;  %1032 = vmatmul.mubr.f32.gmra.mxu1 %v62_v33  ;;  %v335_v31 = vld [vmem:[%s5305_s1 + $0x678] sm:$0xff]  ;;  %v350_v33 = vld [vmem:[%s5305_s1 + $0x6f0] sm:$0xff] }
  0x54   :  { %2458 = vmatprep.subr.mxu1 %v316_v34  ;;  %956 = vmatprep.mubr.f32.mxu0 %v97_v35  ;;  %v367_v32 = vld [vmem:[%s5305_s1 + $0x778] sm:$0xff]  ;;  %v382_v34 = vld [vmem:[%s5305_s1 + $0x7f0] sm:$0xff]  ;;  %v65_v35 = vld [vmem:[%s5306_s0 + $0x168] sm:$0xff] }
  0x55   :  { %2418 = vmatpush3.msra.mxu0 %v268_v36  ;;  %2459 = vmatpush3.msra.mxu1 %v300_v37  ;;  %v334_v36 = vld [vmem:[%s5305_s1 + $0x670] sm:$0xff] }
  0x56   :  { %957 = vmatmul.mubr.f32.gmra.mxu0 %v96_v38  ;;  %2419 = vmatprep.subr.mxu0 %v283_v39  ;;  %v366_v37 = vld [vmem:[%s5305_s1 + $0x770] sm:$0xff]  ;;  %v64_v38 = vld [vmem:[%s5306_s0 + $0x160] sm:$0xff]  ;;  %v349_v39 = vld [vmem:[%s5305_s1 + $0x6e8] sm:$0xff] }
  0x57   :  { %2460 = vmatprep.subr.mxu1 %v315_v40  ;;  %1036 = vmatprep.mubr.f32.mxu1 %v99_v41  ;;  %v381_v40 = vld [vmem:[%s5305_s1 + $0x7e8] sm:$0xff]  ;;  %v67_v41 = vld [vmem:[%s5306_s0 + $0x178] sm:$0xff] }
  0x58   :  { %2420 = vmatpush3.msra.mxu0 %v267_v42  ;;  %2461 = vmatpush3.msra.mxu1 %v299_v43  ;;  %v333_v42 = vld [vmem:[%s5305_s1 + $0x668] sm:$0xff] }
  0x59   :  { %2421 = vmatprep.subr.mxu0 %v282_v44  ;;  %1037 = vmatmul.mubr.f32.gmra.mxu1 %v98_v45  ;;  %v365_v43 = vld [vmem:[%s5305_s1 + $0x768] sm:$0xff]  ;;  %v348_v44 = vld [vmem:[%s5305_s1 + $0x6e0] sm:$0xff]  ;;  %v66_v45 = vld [vmem:[%s5306_s0 + $0x170] sm:$0xff] }
  0x5a   :  { %2462 = vmatprep.subr.mxu1 %v314_v46  ;;  %2422 = vmatpush3.msra.mxu0 %v266_v47  ;;  %v380_v46 = vld [vmem:[%s5305_s1 + $0x7e0] sm:$0xff]  ;;  %v101_v47 = vld [vmem:[%s5306_s0 + $0x288] sm:$0xff] }
  0x5b   :  { %2463 = vmatpush3.msra.mxu1 %v298_v48  ;;  %2423 = vmatprep.subr.mxu0 %v281_v49  ;;  %v332_v48 = vld [vmem:[%s5305_s1 + $0x660] sm:$0xff] }
  0x5c   :  { %2464 = vmatprep.subr.mxu1 %v313_v50  ;;  %2424 = vmatpush3.msra.mxu0 %v265_v51  ;;  %v364_v49 = vld [vmem:[%s5305_s1 + $0x760] sm:$0xff]  ;;  %v347_v51 = vld [vmem:[%s5305_s1 + $0x6d8] sm:$0xff] }
  0x5d   :  { %2465 = vmatpush3.msra.mxu1 %v297_v52  ;;  %2425 = vmatprep.subr.mxu0 %v280_v53  ;;  %v100_v50 = vld [vmem:[%s5306_s0 + $0x280] sm:$0xff]  ;;  %v379_v52 = vld [vmem:[%s5305_s1 + $0x7d8] sm:$0xff] }
  0x5e   :  { %2466 = vmatprep.subr.mxu1 %v312_v54  ;;  %2426 = vmatpush3.msra.mxu0 %v264_v55  ;;  %v704_v53 = vld [vmem:[%s5307_s2] sm:$0xff]  ;;  %v103_v54 = vld [vmem:[%s5306_s0 + $0x298] sm:$0xff] }
  0x5f   :  { %2467 = vmatpush3.msra.mxu1 %v296_v56  ;;  %2427 = vmatprep.subr.mxu0 %v279_v57  ;;  %v331_v55 = vld [vmem:[%s5305_s1 + $0x658] sm:$0xff]  ;;  %v102_v57 = vld [vmem:[%s5306_s0 + $0x290] sm:$0xff] }
  0x60   :  { %2468 = vmatprep.subr.mxu1 %v311_v58  ;;  %2428 = vmatpush3.msra.mxu0 %v263_v59  ;;  %v363_v56 = vld [vmem:[%s5305_s1 + $0x758] sm:$0xff]  ;;  %v346_v58 = vld [vmem:[%s5305_s1 + $0x6d0] sm:$0xff] }
  0x61   :  { %2469 = vmatpush3.msra.mxu1 %v295_v60  ;;  %2429 = vmatprep.subr.mxu0 %v278_v61  ;;  %v378_v59 = vld [vmem:[%s5305_s1 + $0x7d0] sm:$0xff] }
  0x62   :  { %2470 = vmatprep.subr.mxu1 %v310_v62  ;;  %2430 = vmatpush3.msra.mxu0 %v262_v63  ;;  %v330_v60 = vld [vmem:[%s5305_s1 + $0x650] sm:$0xff]  ;;  %v345_v62 = vld [vmem:[%s5305_s1 + $0x6c8] sm:$0xff] }
  0x63   :  { %2471 = vmatpush3.msra.mxu1 %v294_v0  ;;  %2431 = vmatprep.subr.mxu0 %v277_v1  ;;  %v362_v61 = vld [vmem:[%s5305_s1 + $0x750] sm:$0xff]  ;;  %v377_v63 = vld [vmem:[%s5305_s1 + $0x7c8] sm:$0xff] }
  0x64   :  { %2472 = vmatprep.subr.mxu1 %v309_v2  ;;  %2432 = vmatpush3.msra.mxu0 %v261_v3  ;;  %v329_v0 = vld [vmem:[%s5305_s1 + $0x648] sm:$0xff]  ;;  %v344_v2 = vld [vmem:[%s5305_s1 + $0x6c0] sm:$0xff] }
  0x65   :  { %2473 = vmatpush3.msra.mxu1 %v293_v4  ;;  %2433 = vmatprep.subr.mxu0 %v276_v5  ;;  %v361_v1 = vld [vmem:[%s5305_s1 + $0x748] sm:$0xff]  ;;  %v376_v3 = vld [vmem:[%s5305_s1 + $0x7c0] sm:$0xff] }
  0x66   :  { %2474 = vmatprep.subr.mxu1 %v308_v6  ;;  %2434 = vmatpush3.msra.mxu0 %v260_v7  ;;  %v328_v4 = vld [vmem:[%s5305_s1 + $0x640] sm:$0xff]  ;;  %v343_v6 = vld [vmem:[%s5305_s1 + $0x6b8] sm:$0xff] }
  0x67   :  { %2475 = vmatpush3.msra.mxu1 %v292_v8  ;;  %2435 = vmatprep.subr.mxu0 %v275_v9  ;;  %v360_v5 = vld [vmem:[%s5305_s1 + $0x740] sm:$0xff]  ;;  %v375_v7 = vld [vmem:[%s5305_s1 + $0x7b8] sm:$0xff] }
  0x68   :  { %2476 = vmatprep.subr.mxu1 %v307_v10  ;;  %2436 = vmatpush3.msra.mxu0 %v259_v11  ;;  %v327_v8 = vld [vmem:[%s5305_s1 + $0x638] sm:$0xff]  ;;  %v342_v10 = vld [vmem:[%s5305_s1 + $0x6b0] sm:$0xff] }
  0x69   :  { %2477 = vmatpush3.msra.mxu1 %v291_v12  ;;  %2437 = vmatprep.subr.mxu0 %v274_v13  ;;  %v359_v9 = vld [vmem:[%s5305_s1 + $0x738] sm:$0xff]  ;;  %v374_v11 = vld [vmem:[%s5305_s1 + $0x7b0] sm:$0xff] }
  0x6a   :  { %2478 = vmatprep.subr.mxu1 %v306_v14  ;;  %2438 = vmatpush3.msra.mxu0 %v258_v15  ;;  %v326_v12 = vld [vmem:[%s5305_s1 + $0x630] sm:$0xff]  ;;  %v341_v14 = vld [vmem:[%s5305_s1 + $0x6a8] sm:$0xff] }
  0x6b   :  { %2479 = vmatpush3.msra.mxu1 %v290_v16  ;;  %2439 = vmatprep.subr.mxu0 %v273_v17  ;;  %v358_v13 = vld [vmem:[%s5305_s1 + $0x730] sm:$0xff]  ;;  %v373_v15 = vld [vmem:[%s5305_s1 + $0x7a8] sm:$0xff] }
  0x6c   :  { %2480 = vmatprep.subr.mxu1 %v305_v18  ;;  %2440 = vmatpush3.msra.mxu0 %v257_v19  ;;  %v325_v16 = vld [vmem:[%s5305_s1 + $0x628] sm:$0xff]  ;;  %v340_v18 = vld [vmem:[%s5305_s1 + $0x6a0] sm:$0xff] }
  0x6d   :  { %2481 = vmatpush3.msra.mxu1 %v289_v20  ;;  %2441 = vmatprep.subr.mxu0 %v272_v21  ;;  %v357_v17 = vld [vmem:[%s5305_s1 + $0x728] sm:$0xff]  ;;  %v372_v19 = vld [vmem:[%s5305_s1 + $0x7a0] sm:$0xff] }
  0x6e   :  { %2482 = vmatprep.subr.mxu1 %v304_v22  ;;  %2442 = vmatpush3.msra.mxu0 %v256_v23  ;;  %v324_v20 = vld [vmem:[%s5305_s1 + $0x620] sm:$0xff]  ;;  %v339_v22 = vld [vmem:[%s5305_s1 + $0x698] sm:$0xff] }
  0x6f   :  { %1106 = vmatprep.mubr.f32.mxu0 %v29_v24  ;;  %2483 = vmatpush3.msra.mxu1 %v288_v25  ;;  %v356_v21 = vld [vmem:[%s5305_s1 + $0x720] sm:$0xff]  ;;  %v371_v23 = vld [vmem:[%s5305_s1 + $0x798] sm:$0xff] }
  0x70   :  { %1107 = vmatmul.mubr.f32.vlgmr.msra.gmra.mxu0 %v28_v26  ;;  %1186 = vmatprep.mubr.f32.mxu1 %v31_v27  ;;  %v323_v24 = vld [vmem:[%s5305_s1 + $0x618] sm:$0xff]  ;;  %v338_v26 = vld [vmem:[%s5305_s1 + $0x690] sm:$0xff] }
  0x71   :  { %2493 = vmatprep.subr.mxu0 %v351_v28  ;;  %2534 = vmatprep.subr.mxu1 %v383_v29  ;;  %v355_v25 = vld [vmem:[%s5305_s1 + $0x718] sm:$0xff]  ;;  %v370_v27 = vld [vmem:[%s5305_s1 + $0x790] sm:$0xff] }
  0x72   :  { %1187 = vmatmul.mubr.f32.vlgmr.msra.gmra.mxu1 %v30_v30  ;;  %2494 = vmatpush3.msra.mxu0 %v335_v31  ;;  %v322_v28 = vld [vmem:[%s5305_s1 + $0x610] sm:$0xff]  ;;  %v337_v30 = vld [vmem:[%s5305_s1 + $0x688] sm:$0xff] }
  0x73   :  { %2535 = vmatpush3.msra.mxu1 %v367_v32  ;;  %2495 = vmatprep.subr.mxu0 %v350_v33  ;;  %v354_v29 = vld [vmem:[%s5305_s1 + $0x710] sm:$0xff]  ;;  %v369_v31 = vld [vmem:[%s5305_s1 + $0x788] sm:$0xff] }
  0x74   :  { %2536 = vmatprep.subr.mxu1 %v382_v34  ;;  %1111 = vmatprep.mubr.f32.mxu0 %v65_v35  ;;  %v321_v32 = vld [vmem:[%s5305_s1 + $0x608] sm:$0xff]  ;;  %v336_v34 = vld [vmem:[%s5305_s1 + $0x680] sm:$0xff] }
  0x75   :  { %2496 = vmatpush3.msra.mxu0 %v334_v36  ;;  %2537 = vmatpush3.msra.mxu1 %v366_v37  ;;  %v353_v33 = vld [vmem:[%s5305_s1 + $0x708] sm:$0xff]  ;;  %v368_v35 = vld [vmem:[%s5305_s1 + $0x780] sm:$0xff] }
  0x76   :  { %1112 = vmatmul.mubr.f32.gmra.mxu0 %v64_v38  ;;  %2497 = vmatprep.subr.mxu0 %v349_v39  ;;  %v320_v36 = vld [vmem:[%s5305_s1 + $0x600] sm:$0xff]  ;;  %v33_v37 = vld [vmem:[%s5306_s0 + $0x68] sm:$0xff] }
  0x77   :  { %2538 = vmatprep.subr.mxu1 %v381_v40  ;;  %1191 = vmatprep.mubr.f32.mxu1 %v67_v41  ;;  %v352_v38 = vld [vmem:[%s5305_s1 + $0x700] sm:$0xff]  ;;  %v705_v39 = vld [vmem:[%s5307_s2 + $0x8] sm:$0xff]  ;;  %v35_v41 = vld [vmem:[%s5306_s0 + $0x78] sm:$0xff] }
  0x78   :  { %2498 = vmatpush3.msra.mxu0 %v333_v42  ;;  %2539 = vmatpush3.msra.mxu1 %v365_v43  ;;  %v32_v40 = vld [vmem:[%s5306_s0 + $0x60] sm:$0xff]  ;;  %v415_v42 = vld [vmem:[%s5305_s1 + $0x8f8] sm:$0xff] }
  0x79   :  { %2499 = vmatprep.subr.mxu0 %v348_v44  ;;  %1192 = vmatmul.mubr.f32.gmra.mxu1 %v66_v45  ;;  %v447_v43 = vld [vmem:[%s5305_s1 + $0x9f8] sm:$0xff]  ;;  %v34_v44 = vld [vmem:[%s5306_s0 + $0x70] sm:$0xff] }
  0x7a   :  { %2540 = vmatprep.subr.mxu1 %v380_v46  ;;  %1116 = vmatprep.mubr.f32.mxu0 %v101_v47  ;;  %v399_v45 = vld [vmem:[%s5305_s1 + $0x878] sm:$0xff]  ;;  %v414_v47 = vld [vmem:[%s5305_s1 + $0x8f0] sm:$0xff] }
  0x7b   :  { %2500 = vmatpush3.msra.mxu0 %v332_v48  ;;  %2541 = vmatpush3.msra.mxu1 %v364_v49  ;;  %v431_v46 = vld [vmem:[%s5305_s1 + $0x978] sm:$0xff]  ;;  %v446_v48 = vld [vmem:[%s5305_s1 + $0x9f0] sm:$0xff]  ;;  %v69_v49 = vld [vmem:[%s5306_s0 + $0x188] sm:$0xff] }
  0x7c   :  { %1117 = vmatmul.mubr.f32.gmra.mxu0 %v100_v50  ;;  %2501 = vmatprep.subr.mxu0 %v347_v51  ;;  %v398_v50 = vld [vmem:[%s5305_s1 + $0x870] sm:$0xff] }
  0x7d   :  { %2542 = vmatprep.subr.mxu1 %v379_v52  ;;  %709 = vperm.xlu0 %2986, %v704_v53   ;;  %v430_v51 = vld [vmem:[%s5305_s1 + $0x970] sm:$0xff]  ;;  %v68_v53 = vld [vmem:[%s5306_s0 + $0x180] sm:$0xff] }
  0x7e   :  { %1196 = vmatprep.mubr.f32.mxu1 %v103_v54  ;;  %2502 = vmatpush3.msra.mxu0 %v331_v55  ;;  %v706_v52 = vld [vmem:[%s5307_s2 + $0x10] sm:$0xff]  ;;  %v413_v54 = vld [vmem:[%s5305_s1 + $0x8e8] sm:$0xff] }
  0x7f   :  { %2543 = vmatpush3.msra.mxu1 %v363_v56  ;;  %2503 = vmatprep.subr.mxu0 %v346_v58  ;;  %v445_v55 = vld [vmem:[%s5305_s1 + $0x9e8] sm:$0xff]  ;;  %v71_v56 = vld [vmem:[%s5306_s0 + $0x198] sm:$0xff] }
  0x80   :  { %1197 = vmatmul.mubr.f32.gmra.mxu1 %v102_v57  ;;  %2544 = vmatprep.subr.mxu1 %v378_v59  ;;  %v397_v57 = vld [vmem:[%s5305_s1 + $0x868] sm:$0xff]  ;;  %v70_v59 = vld [vmem:[%s5306_s0 + $0x190] sm:$0xff] }
  0x81   :  { %2504 = vmatpush3.msra.mxu0 %v330_v60  ;;  %2545 = vmatpush3.msra.mxu1 %v362_v61  ;;  %v429_v58 = vld [vmem:[%s5305_s1 + $0x968] sm:$0xff]  ;;  %v412_v60 = vld [vmem:[%s5305_s1 + $0x8e0] sm:$0xff] }
  0x82   :  { %2505 = vmatprep.subr.mxu0 %v345_v62  ;;  %2546 = vmatprep.subr.mxu1 %v377_v63  ;;  %v444_v61 = vld [vmem:[%s5305_s1 + $0x9e0] sm:$0xff]  ;;  %v105_v62 = vld [vmem:[%s5306_s0 + $0x2a8] sm:$0xff] }
  0x83   :  { %2506 = vmatpush3.msra.mxu0 %v329_v0  ;;  %2547 = vmatpush3.msra.mxu1 %v361_v1  ;;  %v396_v63 = vld [vmem:[%s5305_s1 + $0x860] sm:$0xff] }
  0x84   :  { %2507 = vmatprep.subr.mxu0 %v344_v2  ;;  %2548 = vmatprep.subr.mxu1 %v376_v3  ;;  %v428_v0 = vld [vmem:[%s5305_s1 + $0x960] sm:$0xff]  ;;  %v411_v2 = vld [vmem:[%s5305_s1 + $0x8d8] sm:$0xff] }
  0x85   :  { %2508 = vmatpush3.msra.mxu0 %v328_v4  ;;  %2549 = vmatpush3.msra.mxu1 %v360_v5  ;;  %v104_v1 = vld [vmem:[%s5306_s0 + $0x2a0] sm:$0xff]  ;;  %v443_v3 = vld [vmem:[%s5305_s1 + $0x9d8] sm:$0xff] }
  0x86   :  { %2509 = vmatprep.subr.mxu0 %v343_v6  ;;  %2550 = vmatprep.subr.mxu1 %v375_v7  ;;  %v107_v4 = vld [vmem:[%s5306_s0 + $0x2b8] sm:$0xff]  ;;  %v106_v7 = vld [vmem:[%s5306_s0 + $0x2b0] sm:$0xff] }
  0x87   :  { %2510 = vmatpush3.msra.mxu0 %v327_v8  ;;  %2551 = vmatpush3.msra.mxu1 %v359_v9  ;;  %v395_v5 = vld [vmem:[%s5305_s1 + $0x858] sm:$0xff]  ;;  %v410_v8 = vld [vmem:[%s5305_s1 + $0x8d0] sm:$0xff] }
  0x88   :  { %2511 = vmatprep.subr.mxu0 %v342_v10  ;;  %2552 = vmatprep.subr.mxu1 %v374_v11  ;;  %v427_v6 = vld [vmem:[%s5305_s1 + $0x958] sm:$0xff]  ;;  %v442_v9 = vld [vmem:[%s5305_s1 + $0x9d0] sm:$0xff] }
  0x89   :  { %2512 = vmatpush3.msra.mxu0 %v326_v12  ;;  %2553 = vmatpush3.msra.mxu1 %v358_v13  ;;  %v394_v10 = vld [vmem:[%s5305_s1 + $0x850] sm:$0xff]  ;;  %v409_v12 = vld [vmem:[%s5305_s1 + $0x8c8] sm:$0xff] }
  0x8a   :  { %2513 = vmatprep.subr.mxu0 %v341_v14  ;;  %2554 = vmatprep.subr.mxu1 %v373_v15  ;;  %v426_v11 = vld [vmem:[%s5305_s1 + $0x950] sm:$0xff]  ;;  %v441_v13 = vld [vmem:[%s5305_s1 + $0x9c8] sm:$0xff] }
  0x8b   :  { %2514 = vmatpush3.msra.mxu0 %v325_v16  ;;  %2555 = vmatpush3.msra.mxu1 %v357_v17  ;;  %v393_v14 = vld [vmem:[%s5305_s1 + $0x848] sm:$0xff]  ;;  %v408_v16 = vld [vmem:[%s5305_s1 + $0x8c0] sm:$0xff] }
  0x8c   :  { %2515 = vmatprep.subr.mxu0 %v340_v18  ;;  %2556 = vmatprep.subr.mxu1 %v372_v19  ;;  %v425_v15 = vld [vmem:[%s5305_s1 + $0x948] sm:$0xff]  ;;  %v440_v17 = vld [vmem:[%s5305_s1 + $0x9c0] sm:$0xff] }
  0x8d   :  { %2516 = vmatpush3.msra.mxu0 %v324_v20  ;;  %2557 = vmatpush3.msra.mxu1 %v356_v21  ;;  %v392_v18 = vld [vmem:[%s5305_s1 + $0x840] sm:$0xff]  ;;  %v407_v20 = vld [vmem:[%s5305_s1 + $0x8b8] sm:$0xff] }
  0x8e   :  { %2517 = vmatprep.subr.mxu0 %v339_v22  ;;  %2558 = vmatprep.subr.mxu1 %v371_v23  ;;  %v424_v19 = vld [vmem:[%s5305_s1 + $0x940] sm:$0xff]  ;;  %v439_v21 = vld [vmem:[%s5305_s1 + $0x9b8] sm:$0xff] }
  0x8f   :  { %2518 = vmatpush3.msra.mxu0 %v323_v24  ;;  %2559 = vmatpush3.msra.mxu1 %v355_v25  ;;  %v391_v22 = vld [vmem:[%s5305_s1 + $0x838] sm:$0xff]  ;;  %v406_v24 = vld [vmem:[%s5305_s1 + $0x8b0] sm:$0xff] }
  0x90   :  { %2519 = vmatprep.subr.mxu0 %v338_v26  ;;  %2560 = vmatprep.subr.mxu1 %v370_v27  ;;  %v423_v23 = vld [vmem:[%s5305_s1 + $0x938] sm:$0xff]  ;;  %v438_v25 = vld [vmem:[%s5305_s1 + $0x9b0] sm:$0xff] }
  0x91   :  { %2520 = vmatpush3.msra.mxu0 %v322_v28  ;;  %2561 = vmatpush3.msra.mxu1 %v354_v29  ;;  %v390_v26 = vld [vmem:[%s5305_s1 + $0x830] sm:$0xff]  ;;  %v405_v28 = vld [vmem:[%s5305_s1 + $0x8a8] sm:$0xff] }
  0x92   :  { %2521 = vmatprep.subr.mxu0 %v337_v30  ;;  %2562 = vmatprep.subr.mxu1 %v369_v31  ;;  %v422_v27 = vld [vmem:[%s5305_s1 + $0x930] sm:$0xff]  ;;  %v437_v29 = vld [vmem:[%s5305_s1 + $0x9a8] sm:$0xff] }
  0x93   :  { %2522 = vmatpush3.msra.mxu0 %v321_v32  ;;  %2563 = vmatpush3.msra.mxu1 %v353_v33  ;;  %v389_v30 = vld [vmem:[%s5305_s1 + $0x828] sm:$0xff]  ;;  %v404_v32 = vld [vmem:[%s5305_s1 + $0x8a0] sm:$0xff] }
  0x94   :  { %2523 = vmatprep.subr.mxu0 %v336_v34  ;;  %2564 = vmatprep.subr.mxu1 %v368_v35  ;;  %v421_v31 = vld [vmem:[%s5305_s1 + $0x928] sm:$0xff]  ;;  %v436_v33 = vld [vmem:[%s5305_s1 + $0x9a0] sm:$0xff] }
  0x95   :  { %2524 = vmatpush3.msra.mxu0 %v320_v36  ;;  %1266 = vmatprep.mubr.f32.mxu0 %v33_v37  ;;  %v388_v34 = vld [vmem:[%s5305_s1 + $0x820] sm:$0xff]  ;;  %v403_v36 = vld [vmem:[%s5305_s1 + $0x898] sm:$0xff] }
  0x96   :  { %2565 = vmatpush3.msra.mxu1 %v352_v38  ;;  %714 = vperm.xlu0 %2986, %v705_v39   ;;  %v420_v35 = vld [vmem:[%s5305_s1 + $0x920] sm:$0xff]  ;;  %v435_v37 = vld [vmem:[%s5305_s1 + $0x998] sm:$0xff] }
  0x97   :  { %1267 = vmatmul.mubr.f32.vlgmr.msra.gmra.mxu0 %v32_v40  ;;  %1346 = vmatprep.mubr.f32.mxu1 %v35_v41  ;;  %v387_v38 = vld [vmem:[%s5305_s1 + $0x818] sm:$0xff]  ;;  %v402_v40 = vld [vmem:[%s5305_s1 + $0x890] sm:$0xff] }
  0x98   :  { %2575 = vmatprep.subr.mxu0 %v415_v42  ;;  %2616 = vmatprep.subr.mxu1 %v447_v43  ;;  %v419_v39 = vld [vmem:[%s5305_s1 + $0x918] sm:$0xff]  ;;  %v434_v41 = vld [vmem:[%s5305_s1 + $0x990] sm:$0xff] }
  0x99   :  { %1347 = vmatmul.mubr.f32.vlgmr.msra.gmra.mxu1 %v34_v44  ;;  %2576 = vmatpush3.msra.mxu0 %v399_v45  ;;  %v386_v42 = vld [vmem:[%s5305_s1 + $0x810] sm:$0xff]  ;;  %v401_v44 = vld [vmem:[%s5305_s1 + $0x888] sm:$0xff] }
  0x9a   :  { %2617 = vmatpush3.msra.mxu1 %v431_v46  ;;  %2577 = vmatprep.subr.mxu0 %v414_v47  ;;  %v418_v43 = vld [vmem:[%s5305_s1 + $0x910] sm:$0xff]  ;;  %v433_v45 = vld [vmem:[%s5305_s1 + $0x988] sm:$0xff] }
  0x9b   :  { %2618 = vmatprep.subr.mxu1 %v446_v48  ;;  %1271 = vmatprep.mubr.f32.mxu0 %v69_v49  ;;  %v385_v46 = vld [vmem:[%s5305_s1 + $0x808] sm:$0xff]  ;;  %v400_v48 = vld [vmem:[%s5305_s1 + $0x880] sm:$0xff] }
  0x9c   :  { %2578 = vmatpush3.msra.mxu0 %v398_v50  ;;  %2619 = vmatpush3.msra.mxu1 %v430_v51  ;;  %v417_v47 = vld [vmem:[%s5305_s1 + $0x908] sm:$0xff]  ;;  %v432_v49 = vld [vmem:[%s5305_s1 + $0x980] sm:$0xff] }
  0x9d   :  { %719 = vperm.xlu1 %2987, %v706_v52   ;;  %1272 = vmatmul.mubr.f32.gmra.mxu0 %v68_v53  ;;  %v384_v50 = vld [vmem:[%s5305_s1 + $0x800] sm:$0xff]  ;;  %v37_v51 = vld [vmem:[%s5306_s0 + $0x88] sm:$0xff] }
  0x9e   :  { %2579 = vmatprep.subr.mxu0 %v413_v54  ;;  %2620 = vmatprep.subr.mxu1 %v445_v55  ;;  %v416_v52 = vld [vmem:[%s5305_s1 + $0x900] sm:$0xff]  ;;  %v39_v54 = vld [vmem:[%s5306_s0 + $0x98] sm:$0xff] }
  0x9f   :  { %1351 = vmatprep.mubr.f32.mxu1 %v71_v56  ;;  %2580 = vmatpush3.msra.mxu0 %v397_v57  ;;  %v36_v53 = vld [vmem:[%s5306_s0 + $0x80] sm:$0xff]  ;;  %v479_v55 = vld [vmem:[%s5305_s1 + $0xaf8] sm:$0xff]  ;;  %v38_v57 = vld [vmem:[%s5306_s0 + $0x90] sm:$0xff] }
  0xa0   :  { %2621 = vmatpush3.msra.mxu1 %v429_v58  ;;  %2581 = vmatprep.subr.mxu0 %v412_v60  ;;  %v511_v56 = vld [vmem:[%s5305_s1 + $0xbf8] sm:$0xff]  ;;  %v478_v60 = vld [vmem:[%s5305_s1 + $0xaf0] sm:$0xff] }
  0xa1   :  { %1352 = vmatmul.mubr.f32.gmra.mxu1 %v70_v59  ;;  %2622 = vmatprep.subr.mxu1 %v444_v61  ;;  %v463_v58 = vld [vmem:[%s5305_s1 + $0xa78] sm:$0xff]  ;;  %v510_v61 = vld [vmem:[%s5305_s1 + $0xbf0] sm:$0xff] }
  0xa2   :  { %1276 = vmatprep.mubr.f32.mxu0 %v105_v62  ;;  %2582 = vmatpush3.msra.mxu0 %v396_v63  ;;  %v495_v59 = vld [vmem:[%s5305_s1 + $0xb78] sm:$0xff]  ;;  %v73_v62 = vld [vmem:[%s5306_s0 + $0x1a8] sm:$0xff]  ;;  %v462_v63 = vld [vmem:[%s5305_s1 + $0xa70] sm:$0xff] }
  0xa3   :  { %2623 = vmatpush3.msra.mxu1 %v428_v0  ;;  %1277 = vmatmul.mubr.f32.gmra.mxu0 %v104_v1  ;;  %v494_v0 = vld [vmem:[%s5305_s1 + $0xb70] sm:$0xff]  ;;  %v72_v1 = vld [vmem:[%s5306_s0 + $0x1a0] sm:$0xff] }
  0xa4   :  { %2583 = vmatprep.subr.mxu0 %v411_v2  ;;  %2624 = vmatprep.subr.mxu1 %v443_v3  ;;  %v477_v2 = vld [vmem:[%s5305_s1 + $0xae8] sm:$0xff] }
  0xa5   :  { %1356 = vmatprep.mubr.f32.mxu1 %v107_v4  ;;  %2584 = vmatpush3.msra.mxu0 %v395_v5  ;;  %v509_v3 = vld [vmem:[%s5305_s1 + $0xbe8] sm:$0xff]  ;;  %v75_v4 = vld [vmem:[%s5306_s0 + $0x1b8] sm:$0xff] }
  0xa6   :  { %2625 = vmatpush3.msra.mxu1 %v427_v6  ;;  %2585 = vmatprep.subr.mxu0 %v410_v8  ;;  %v461_v5 = vld [vmem:[%s5305_s1 + $0xa68] sm:$0xff]  ;;  %v476_v8 = vld [vmem:[%s5305_s1 + $0xae0] sm:$0xff] }
  0xa7   :  { %1357 = vmatmul.mubr.f32.gmra.mxu1 %v106_v7  ;;  %2626 = vmatprep.subr.mxu1 %v442_v9  ;;  %v493_v6 = vld [vmem:[%s5305_s1 + $0xb68] sm:$0xff]  ;;  %v74_v7 = vld [vmem:[%s5306_s0 + $0x1b0] sm:$0xff]  ;;  %v508_v9 = vld [vmem:[%s5305_s1 + $0xbe0] sm:$0xff] }
  0xa8   :  { %2586 = vmatpush3.msra.mxu0 %v394_v10  ;;  %2627 = vmatpush3.msra.mxu1 %v426_v11  ;;  %v109_v10 = vld [vmem:[%s5306_s0 + $0x2c8] sm:$0xff]  ;;  %v460_v11 = vld [vmem:[%s5305_s1 + $0xa60] sm:$0xff] }
  0xa9   :  { %2587 = vmatprep.subr.mxu0 %v409_v12  ;;  %2628 = vmatprep.subr.mxu1 %v441_v13  ;;  %v492_v12 = vld [vmem:[%s5305_s1 + $0xb60] sm:$0xff] }
  0xaa   :  { %2588 = vmatpush3.msra.mxu0 %v393_v14  ;;  %2629 = vmatpush3.msra.mxu1 %v425_v15  ;;  %v108_v13 = vld [vmem:[%s5306_s0 + $0x2c0] sm:$0xff]  ;;  %v475_v14 = vld [vmem:[%s5305_s1 + $0xad8] sm:$0xff] }
  0xab   :  { %2589 = vmatprep.subr.mxu0 %v408_v16  ;;  %2630 = vmatprep.subr.mxu1 %v440_v17  ;;  %v507_v15 = vld [vmem:[%s5305_s1 + $0xbd8] sm:$0xff] }
  0xac   :  { %2590 = vmatpush3.msra.mxu0 %v392_v18  ;;  %2631 = vmatpush3.msra.mxu1 %v424_v19  ;;  %v111_v16 = vld [vmem:[%s5306_s0 + $0x2d8] sm:$0xff]  ;;  %v110_v19 = vld [vmem:[%s5306_s0 + $0x2d0] sm:$0xff] }
  0xad   :  { %2591 = vmatprep.subr.mxu0 %v407_v20  ;;  %2632 = vmatprep.subr.mxu1 %v439_v21  ;;  %v459_v17 = vld [vmem:[%s5305_s1 + $0xa58] sm:$0xff]  ;;  %v474_v20 = vld [vmem:[%s5305_s1 + $0xad0] sm:$0xff] }
  0xae   :  { %2592 = vmatpush3.msra.mxu0 %v391_v22  ;;  %2633 = vmatpush3.msra.mxu1 %v423_v23  ;;  %v491_v18 = vld [vmem:[%s5305_s1 + $0xb58] sm:$0xff]  ;;  %v506_v21 = vld [vmem:[%s5305_s1 + $0xbd0] sm:$0xff] }
  0xaf   :  { %2593 = vmatprep.subr.mxu0 %v406_v24  ;;  %2634 = vmatprep.subr.mxu1 %v438_v25  ;;  %v458_v22 = vld [vmem:[%s5305_s1 + $0xa50] sm:$0xff]  ;;  %v473_v24 = vld [vmem:[%s5305_s1 + $0xac8] sm:$0xff] }
  0xb0   :  { %2594 = vmatpush3.msra.mxu0 %v390_v26  ;;  %2635 = vmatpush3.msra.mxu1 %v422_v27  ;;  %v490_v23 = vld [vmem:[%s5305_s1 + $0xb50] sm:$0xff]  ;;  %v505_v25 = vld [vmem:[%s5305_s1 + $0xbc8] sm:$0xff] }
  0xb1   :  { %2595 = vmatprep.subr.mxu0 %v405_v28  ;;  %2636 = vmatprep.subr.mxu1 %v437_v29  ;;  %v457_v26 = vld [vmem:[%s5305_s1 + $0xa48] sm:$0xff]  ;;  %v472_v28 = vld [vmem:[%s5305_s1 + $0xac0] sm:$0xff] }
  0xb2   :  { %2596 = vmatpush3.msra.mxu0 %v389_v30  ;;  %2637 = vmatpush3.msra.mxu1 %v421_v31  ;;  %v489_v27 = vld [vmem:[%s5305_s1 + $0xb48] sm:$0xff]  ;;  %v504_v29 = vld [vmem:[%s5305_s1 + $0xbc0] sm:$0xff] }
  0xb3   :  { %2597 = vmatprep.subr.mxu0 %v404_v32  ;;  %2638 = vmatprep.subr.mxu1 %v436_v33  ;;  %v456_v30 = vld [vmem:[%s5305_s1 + $0xa40] sm:$0xff]  ;;  %v471_v32 = vld [vmem:[%s5305_s1 + $0xab8] sm:$0xff] }
  0xb4   :  { %2598 = vmatpush3.msra.mxu0 %v388_v34  ;;  %2639 = vmatpush3.msra.mxu1 %v420_v35  ;;  %v488_v31 = vld [vmem:[%s5305_s1 + $0xb40] sm:$0xff]  ;;  %v503_v33 = vld [vmem:[%s5305_s1 + $0xbb8] sm:$0xff] }
  0xb5   :  { %2599 = vmatprep.subr.mxu0 %v403_v36  ;;  %2640 = vmatprep.subr.mxu1 %v435_v37  ;;  %v455_v34 = vld [vmem:[%s5305_s1 + $0xa38] sm:$0xff]  ;;  %v470_v36 = vld [vmem:[%s5305_s1 + $0xab0] sm:$0xff] }
  0xb6   :  { %2600 = vmatpush3.msra.mxu0 %v387_v38  ;;  %2641 = vmatpush3.msra.mxu1 %v419_v39  ;;  %v487_v35 = vld [vmem:[%s5305_s1 + $0xb38] sm:$0xff]  ;;  %v502_v37 = vld [vmem:[%s5305_s1 + $0xbb0] sm:$0xff] }
  0xb7   :  { %2601 = vmatprep.subr.mxu0 %v402_v40  ;;  %2642 = vmatprep.subr.mxu1 %v434_v41  ;;  %v454_v38 = vld [vmem:[%s5305_s1 + $0xa30] sm:$0xff]  ;;  %v469_v40 = vld [vmem:[%s5305_s1 + $0xaa8] sm:$0xff] }
  0xb8   :  { %2602 = vmatpush3.msra.mxu0 %v386_v42  ;;  %2643 = vmatpush3.msra.mxu1 %v418_v43  ;;  %v486_v39 = vld [vmem:[%s5305_s1 + $0xb30] sm:$0xff]  ;;  %v501_v41 = vld [vmem:[%s5305_s1 + $0xba8] sm:$0xff] }
  0xb9   :  { %2603 = vmatprep.subr.mxu0 %v401_v44  ;;  %2644 = vmatprep.subr.mxu1 %v433_v45  ;;  %v453_v42 = vld [vmem:[%s5305_s1 + $0xa28] sm:$0xff]  ;;  %v468_v44 = vld [vmem:[%s5305_s1 + $0xaa0] sm:$0xff] }
  0xba   :  { %2604 = vmatpush3.msra.mxu0 %v385_v46  ;;  %2645 = vmatpush3.msra.mxu1 %v417_v47  ;;  %v485_v43 = vld [vmem:[%s5305_s1 + $0xb28] sm:$0xff]  ;;  %v500_v45 = vld [vmem:[%s5305_s1 + $0xba0] sm:$0xff] }
  0xbb   :  { %2605 = vmatprep.subr.mxu0 %v400_v48  ;;  %2646 = vmatprep.subr.mxu1 %v432_v49  ;;  %v452_v46 = vld [vmem:[%s5305_s1 + $0xa20] sm:$0xff]  ;;  %v467_v48 = vld [vmem:[%s5305_s1 + $0xa98] sm:$0xff] }
  0xbc   :  { %2606 = vmatpush3.msra.mxu0 %v384_v50  ;;  %1426 = vmatprep.mubr.f32.mxu0 %v37_v51  ;;  %v484_v47 = vld [vmem:[%s5305_s1 + $0xb20] sm:$0xff]  ;;  %v499_v49 = vld [vmem:[%s5305_s1 + $0xb98] sm:$0xff] }
  0xbd   :  { %2647 = vmatpush3.msra.mxu1 %v416_v52  ;;  %1427 = vmatmul.mubr.f32.vlgmr.msra.gmra.mxu0 %v36_v53  ;;  %v451_v50 = vld [vmem:[%s5305_s1 + $0xa18] sm:$0xff]  ;;  %v466_v52 = vld [vmem:[%s5305_s1 + $0xa90] sm:$0xff] }
  0xbe   :  { %1506 = vmatprep.mubr.f32.mxu1 %v39_v54  ;;  %2657 = vmatprep.subr.mxu0 %v479_v55  ;;  %v483_v51 = vld [vmem:[%s5305_s1 + $0xb18] sm:$0xff]  ;;  %v498_v53 = vld [vmem:[%s5305_s1 + $0xb90] sm:$0xff] }
  0xbf   :  { %2698 = vmatprep.subr.mxu1 %v511_v56  ;;  %1507 = vmatmul.mubr.f32.vlgmr.msra.gmra.mxu1 %v38_v57  ;;  %v450_v54 = vld [vmem:[%s5305_s1 + $0xa10] sm:$0xff]  ;;  %v465_v56 = vld [vmem:[%s5305_s1 + $0xa88] sm:$0xff] }
  0xc0   :  { %2658 = vmatpush3.msra.mxu0 %v463_v58  ;;  %2699 = vmatpush3.msra.mxu1 %v495_v59  ;;  %v482_v55 = vld [vmem:[%s5305_s1 + $0xb10] sm:$0xff]  ;;  %v497_v57 = vld [vmem:[%s5305_s1 + $0xb88] sm:$0xff] }
  0xc1   :  { %2659 = vmatprep.subr.mxu0 %v478_v60  ;;  %2700 = vmatprep.subr.mxu1 %v510_v61  ;;  %v449_v58 = vld [vmem:[%s5305_s1 + $0xa08] sm:$0xff]  ;;  %v464_v60 = vld [vmem:[%s5305_s1 + $0xa80] sm:$0xff] }
  0xc2   :  { %1431 = vmatprep.mubr.f32.mxu0 %v73_v62  ;;  %2660 = vmatpush3.msra.mxu0 %v462_v63  ;;  %v481_v59 = vld [vmem:[%s5305_s1 + $0xb08] sm:$0xff]  ;;  %v496_v61 = vld [vmem:[%s5305_s1 + $0xb80] sm:$0xff] }
  0xc3   :  { %2701 = vmatpush3.msra.mxu1 %v494_v0  ;;  %1432 = vmatmul.mubr.f32.gmra.mxu0 %v72_v1  ;;  %v448_v62 = vld [vmem:[%s5305_s1 + $0xa00] sm:$0xff]  ;;  %v41_v63 = vld [vmem:[%s5306_s0 + $0xa8] sm:$0xff] }
  0xc4   :  { %2661 = vmatprep.subr.mxu0 %v477_v2  ;;  %2702 = vmatprep.subr.mxu1 %v509_v3  ;;  %v480_v0 = vld [vmem:[%s5305_s1 + $0xb00] sm:$0xff]  ;;  %v43_v2 = vld [vmem:[%s5306_s0 + $0xb8] sm:$0xff] }
  0xc5   :  { %1511 = vmatprep.mubr.f32.mxu1 %v75_v4  ;;  %2662 = vmatpush3.msra.mxu0 %v461_v5  ;;  %v40_v1 = vld [vmem:[%s5306_s0 + $0xa0] sm:$0xff]  ;;  %v543_v3 = vld [vmem:[%s5305_s1 + $0xcf8] sm:$0xff]  ;;  %v42_v5 = vld [vmem:[%s5306_s0 + $0xb0] sm:$0xff] }
  0xc6   :  { %2703 = vmatpush3.msra.mxu1 %v493_v6  ;;  %2663 = vmatprep.subr.mxu0 %v476_v8  ;;  %v575_v4 = vld [vmem:[%s5305_s1 + $0xdf8] sm:$0xff]  ;;  %v542_v8 = vld [vmem:[%s5305_s1 + $0xcf0] sm:$0xff] }
  0xc7   :  { %1512 = vmatmul.mubr.f32.gmra.mxu1 %v74_v7  ;;  %2704 = vmatprep.subr.mxu1 %v508_v9  ;;  %v527_v6 = vld [vmem:[%s5305_s1 + $0xc78] sm:$0xff] }
  0xc8   :  { %1436 = vmatprep.mubr.f32.mxu0 %v109_v10  ;;  %2664 = vmatpush3.msra.mxu0 %v460_v11  ;;  %v559_v7 = vld [vmem:[%s5305_s1 + $0xd78] sm:$0xff]  ;;  %v574_v10 = vld [vmem:[%s5305_s1 + $0xdf0] sm:$0xff]  ;;  %v77_v11 = vld [vmem:[%s5306_s0 + $0x1c8] sm:$0xff] }
  0xc9   :  { %2705 = vmatpush3.msra.mxu1 %v492_v12  ;;  %1437 = vmatmul.mubr.f32.gmra.mxu0 %v108_v13  ;;  %v526_v12 = vld [vmem:[%s5305_s1 + $0xc70] sm:$0xff] }
  0xca   :  { %2665 = vmatprep.subr.mxu0 %v475_v14  ;;  %2706 = vmatprep.subr.mxu1 %v507_v15  ;;  %v558_v13 = vld [vmem:[%s5305_s1 + $0xd70] sm:$0xff] }
  0xcb   :  { %1516 = vmatprep.mubr.f32.mxu1 %v111_v16  ;;  %2666 = vmatpush3.msra.mxu0 %v459_v17  ;;  %v76_v16 = vld [vmem:[%s5306_s0 + $0x1c0] sm:$0xff]  ;;  %v541_v17 = vld [vmem:[%s5305_s1 + $0xce8] sm:$0xff] }
  0xcc   :  { %2707 = vmatpush3.msra.mxu1 %v491_v18  ;;  %2667 = vmatprep.subr.mxu0 %v474_v20  ;;  %v79_v20 = vld [vmem:[%s5306_s0 + $0x1d8] sm:$0xff] }
  0xcd   :  { %1517 = vmatmul.mubr.f32.gmra.mxu1 %v110_v19  ;;  %2708 = vmatprep.subr.mxu1 %v506_v21  ;;  %v573_v19 = vld [vmem:[%s5305_s1 + $0xde8] sm:$0xff] }
  0xce   :  { %2668 = vmatpush3.msra.mxu0 %v458_v22  ;;  %2709 = vmatpush3.msra.mxu1 %v490_v23  ;;  %v525_v22 = vld [vmem:[%s5305_s1 + $0xc68] sm:$0xff] }
  0xcf   :  { %2669 = vmatprep.subr.mxu0 %v473_v24  ;;  %2710 = vmatprep.subr.mxu1 %v505_v25  ;;  %v557_v23 = vld [vmem:[%s5305_s1 + $0xd68] sm:$0xff]  ;;  %v78_v25 = vld [vmem:[%s5306_s0 + $0x1d0] sm:$0xff] }
  0xd0   :  { %2670 = vmatpush3.msra.mxu0 %v457_v26  ;;  %2711 = vmatpush3.msra.mxu1 %v489_v27  ;;  %v540_v26 = vld [vmem:[%s5305_s1 + $0xce0] sm:$0xff] }
  0xd1   :  { %2671 = vmatprep.subr.mxu0 %v472_v28  ;;  %2712 = vmatprep.subr.mxu1 %v504_v29  ;;  %v572_v27 = vld [vmem:[%s5305_s1 + $0xde0] sm:$0xff]  ;;  %v113_v28 = vld [vmem:[%s5306_s0 + $0x2e8] sm:$0xff] }
  0xd2   :  { %2672 = vmatpush3.msra.mxu0 %v456_v30  ;;  %2713 = vmatpush3.msra.mxu1 %v488_v31  ;;  %v524_v29 = vld [vmem:[%s5305_s1 + $0xc60] sm:$0xff] }
  0xd3   :  { %2673 = vmatprep.subr.mxu0 %v471_v32  ;;  %2714 = vmatprep.subr.mxu1 %v503_v33  ;;  %v556_v30 = vld [vmem:[%s5305_s1 + $0xd60] sm:$0xff]  ;;  %v539_v32 = vld [vmem:[%s5305_s1 + $0xcd8] sm:$0xff] }
  0xd4   :  { %2674 = vmatpush3.msra.mxu0 %v455_v34  ;;  %2715 = vmatpush3.msra.mxu1 %v487_v35  ;;  %v112_v31 = vld [vmem:[%s5306_s0 + $0x2e0] sm:$0xff]  ;;  %v571_v33 = vld [vmem:[%s5305_s1 + $0xdd8] sm:$0xff] }
  0xd5   :  { %2675 = vmatprep.subr.mxu0 %v470_v36  ;;  %2716 = vmatprep.subr.mxu1 %v502_v37  ;;  %v115_v34 = vld [vmem:[%s5306_s0 + $0x2f8] sm:$0xff]  ;;  %v114_v37 = vld [vmem:[%s5306_s0 + $0x2f0] sm:$0xff] }
  0xd6   :  { %2676 = vmatpush3.msra.mxu0 %v454_v38  ;;  %2717 = vmatpush3.msra.mxu1 %v486_v39  ;;  %v523_v35 = vld [vmem:[%s5305_s1 + $0xc58] sm:$0xff]  ;;  %v538_v38 = vld [vmem:[%s5305_s1 + $0xcd0] sm:$0xff] }
  0xd7   :  { %2677 = vmatprep.subr.mxu0 %v469_v40  ;;  %2718 = vmatprep.subr.mxu1 %v501_v41  ;;  %v555_v36 = vld [vmem:[%s5305_s1 + $0xd58] sm:$0xff]  ;;  %v570_v39 = vld [vmem:[%s5305_s1 + $0xdd0] sm:$0xff] }
  0xd8   :  { %2678 = vmatpush3.msra.mxu0 %v453_v42  ;;  %2719 = vmatpush3.msra.mxu1 %v485_v43  ;;  %v522_v40 = vld [vmem:[%s5305_s1 + $0xc50] sm:$0xff]  ;;  %v537_v42 = vld [vmem:[%s5305_s1 + $0xcc8] sm:$0xff] }
  0xd9   :  { %2679 = vmatprep.subr.mxu0 %v468_v44  ;;  %2720 = vmatprep.subr.mxu1 %v500_v45  ;;  %v554_v41 = vld [vmem:[%s5305_s1 + $0xd50] sm:$0xff]  ;;  %v569_v43 = vld [vmem:[%s5305_s1 + $0xdc8] sm:$0xff] }
  0xda   :  { %2680 = vmatpush3.msra.mxu0 %v452_v46  ;;  %2721 = vmatpush3.msra.mxu1 %v484_v47  ;;  %v521_v44 = vld [vmem:[%s5305_s1 + $0xc48] sm:$0xff]  ;;  %v536_v46 = vld [vmem:[%s5305_s1 + $0xcc0] sm:$0xff] }
  0xdb   :  { %2681 = vmatprep.subr.mxu0 %v467_v48  ;;  %2722 = vmatprep.subr.mxu1 %v499_v49  ;;  %v553_v45 = vld [vmem:[%s5305_s1 + $0xd48] sm:$0xff]  ;;  %v568_v47 = vld [vmem:[%s5305_s1 + $0xdc0] sm:$0xff] }
  0xdc   :  { %2682 = vmatpush3.msra.mxu0 %v451_v50  ;;  %2723 = vmatpush3.msra.mxu1 %v483_v51  ;;  %v520_v48 = vld [vmem:[%s5305_s1 + $0xc40] sm:$0xff]  ;;  %v535_v50 = vld [vmem:[%s5305_s1 + $0xcb8] sm:$0xff] }
  0xdd   :  { %2683 = vmatprep.subr.mxu0 %v466_v52  ;;  %2724 = vmatprep.subr.mxu1 %v498_v53  ;;  %v552_v49 = vld [vmem:[%s5305_s1 + $0xd40] sm:$0xff]  ;;  %v567_v51 = vld [vmem:[%s5305_s1 + $0xdb8] sm:$0xff] }
  0xde   :  { %2684 = vmatpush3.msra.mxu0 %v450_v54  ;;  %2725 = vmatpush3.msra.mxu1 %v482_v55  ;;  %v519_v52 = vld [vmem:[%s5305_s1 + $0xc38] sm:$0xff]  ;;  %v534_v54 = vld [vmem:[%s5305_s1 + $0xcb0] sm:$0xff] }
  0xdf   :  { %2685 = vmatprep.subr.mxu0 %v465_v56  ;;  %2726 = vmatprep.subr.mxu1 %v497_v57  ;;  %v551_v53 = vld [vmem:[%s5305_s1 + $0xd38] sm:$0xff]  ;;  %v566_v55 = vld [vmem:[%s5305_s1 + $0xdb0] sm:$0xff] }
  0xe0   :  { %2686 = vmatpush3.msra.mxu0 %v449_v58  ;;  %2727 = vmatpush3.msra.mxu1 %v481_v59  ;;  %v518_v56 = vld [vmem:[%s5305_s1 + $0xc30] sm:$0xff]  ;;  %v533_v59 = vld [vmem:[%s5305_s1 + $0xca8] sm:$0xff] }
  0xe1   :  { %2687 = vmatprep.subr.mxu0 %v464_v60  ;;  %2728 = vmatprep.subr.mxu1 %v496_v61  ;;  %v550_v58 = vld [vmem:[%s5305_s1 + $0xd30] sm:$0xff]  ;;  %v565_v61 = vld [vmem:[%s5305_s1 + $0xda8] sm:$0xff] }
  0xe2   :  { %2688 = vmatpush3.msra.mxu0 %v448_v62  ;;  %1586 = vmatprep.mubr.f32.mxu0 %v41_v63  ;;  %v517_v62 = vld [vmem:[%s5305_s1 + $0xc28] sm:$0xff] }
  0xe3   :  { %2729 = vmatpush3.msra.mxu1 %v480_v0  ;;  %1587 = vmatmul.mubr.f32.vlgmr.msra.gmra.mxu0 %v40_v1  ;;  %v549_v63 = vld [vmem:[%s5305_s1 + $0xd28] sm:$0xff]  ;;  %v532_v0 = vld [vmem:[%s5305_s1 + $0xca0] sm:$0xff] }
  0xe4   :  { %1666 = vmatprep.mubr.f32.mxu1 %v43_v2  ;;  %v2279_v9 = vpop.f32.mrf.mxu0  ;;  %2739 = vmatprep.subr.mxu0 %v543_v3  ;;  %v564_v2 = vld [vmem:[%s5305_s1 + $0xda0] sm:$0xff] }
  0xe5   :  { %2780 = vmatprep.subr.mxu1 %v575_v4  ;;  %1667 = vmatmul.mubr.f32.vlgmr.msra.gmra.mxu1 %v42_v5  ;;  %v516_v3 = vld [vmem:[%s5305_s1 + $0xc20] sm:$0xff] }
  0xe6   :  { %2740 = vmatpush3.msra.mxu0 %v527_v6  ;;  %v2320_v14 = vpop.f32.mrf.mxu1  ;;  %v2280_v15 = vpop.f32.mrf.mxu0  ;;  %2781 = vmatpush3.msra.mxu1 %v559_v7  ;;  %v548_v5 = vld [vmem:[%s5305_s1 + $0xd20] sm:$0xff]  ;;  %v531_v6 = vld [vmem:[%s5305_s1 + $0xc98] sm:$0xff] }
  0xe7   :  { %2741 = vmatprep.subr.mxu0 %v542_v8  ;;  %v4411_v18 = vadd.f32 %v2280_v15, %v2279_v9  ;;  %2782 = vmatprep.subr.mxu1 %v574_v10  ;;  %v563_v7 = vld [vmem:[%s5305_s1 + $0xd98] sm:$0xff]  ;;  %v514_v15 = vld [vmem:[%s5305_s1 + $0xc10] sm:$0xff] }
  0xe8   :  { %1591 = vmatprep.mubr.f32.mxu0 %v77_v11  ;;  %v2321_v21 = vpop.f32.mrf.mxu1  ;;  %2742 = vmatpush3.msra.mxu0 %v526_v12  ;;  %v515_v8 = vld [vmem:[%s5305_s1 + $0xc18] sm:$0xff]  ;;  %v530_v11 = vld [vmem:[%s5305_s1 + $0xc90] sm:$0xff] }
  0xe9   :  { %2783 = vmatpush3.msra.mxu1 %v558_v13  ;;  %v4425_v24 = vadd.f32 %v2321_v21, %v2320_v14  ;;  %1592 = vmatmul.mubr.f32.gmra.mxu0 %v76_v16  ;;  %v547_v10 = vld [vmem:[%s5305_s1 + $0xd18] sm:$0xff]  ;;  %v562_v14 = vld [vmem:[%s5305_s1 + $0xd90] sm:$0xff] }
  0xea   :  { %2743 = vmatprep.subr.mxu0 %v541_v17  ;;  %2784 = vmatprep.subr.mxu1 %v573_v19  ;;  %v546_v16 = vld [vmem:[%s5305_s1 + $0xd10] sm:$0xff]  ;;  %v529_v17 = vld [vmem:[%s5305_s1 + $0xc88] sm:$0xff] }
  0xeb   :  { %1671 = vmatprep.mubr.f32.mxu1 %v79_v20  ;;  %2744 = vmatpush3.msra.mxu0 %v525_v22  ;;  %v561_v19 = vld [vmem:[%s5305_s1 + $0xd88] sm:$0xff] }
  0xec   :  { %2785 = vmatpush3.msra.mxu1 %v557_v23  ;;  %2745 = vmatprep.subr.mxu0 %v540_v26  ;;  %v513_v20 = vld [vmem:[%s5305_s1 + $0xc08] sm:$0xff]  ;;  %v512_v26 = vld [vmem:[%s5305_s1 + $0xc00] sm:$0xff] }
  0xed   :  { %1672 = vmatmul.mubr.f32.gmra.mxu1 %v78_v25  ;;  %2786 = vmatprep.subr.mxu1 %v572_v27  ;;  %v545_v23 = vld [vmem:[%s5305_s1 + $0xd08] sm:$0xff]  ;;  %v560_v25 = vld [vmem:[%s5305_s1 + $0xd80] sm:$0xff] }
  0xee   :  { %1596 = vmatprep.mubr.f32.mxu0 %v113_v28  ;;  %2746 = vmatpush3.msra.mxu0 %v524_v29  ;;  %v45_v28 = vld [vmem:[%s5306_s0 + $0xc8] sm:$0xff]  ;;  %v544_v29 = vld [vmem:[%s5305_s1 + $0xd00] sm:$0xff] }
  0xef   :  { %2787 = vmatpush3.msra.mxu1 %v556_v30  ;;  %1597 = vmatmul.mubr.f32.gmra.mxu0 %v112_v31 }
  0xf0   :  { %2747 = vmatprep.subr.mxu0 %v539_v32  ;;  %2788 = vmatprep.subr.mxu1 %v571_v33  ;;  %v44_v32 = vld [vmem:[%s5306_s0 + $0xc0] sm:$0xff]  ;;  %v47_v33 = vld [vmem:[%s5306_s0 + $0xd8] sm:$0xff] }
  0xf1   :  { %1676 = vmatprep.mubr.f32.mxu1 %v115_v34  ;;  %2748 = vmatpush3.msra.mxu0 %v523_v35  ;;  %v607_v34 = vld [vmem:[%s5305_s1 + $0xef8] sm:$0xff] }
  0xf2   :  { %2789 = vmatpush3.msra.mxu1 %v555_v36  ;;  %2749 = vmatprep.subr.mxu0 %v538_v38  ;;  %v639_v35 = vld [vmem:[%s5305_s1 + $0xff8] sm:$0xff] }
  0xf3   :  { %1677 = vmatmul.mubr.f32.gmra.mxu1 %v114_v37  ;;  %2790 = vmatprep.subr.mxu1 %v570_v39  ;;  %v46_v37 = vld [vmem:[%s5306_s0 + $0xd0] sm:$0xff]  ;;  %v591_v38 = vld [vmem:[%s5305_s1 + $0xe78] sm:$0xff] }
  0xf4   :  { %2750 = vmatpush3.msra.mxu0 %v522_v40  ;;  %2791 = vmatpush3.msra.mxu1 %v554_v41  ;;  %v623_v40 = vld [vmem:[%s5305_s1 + $0xf78] sm:$0xff]  ;;  %v606_v41 = vld [vmem:[%s5305_s1 + $0xef0] sm:$0xff] }
  0xf5   :  { %2751 = vmatprep.subr.mxu0 %v537_v42  ;;  %2792 = vmatprep.subr.mxu1 %v569_v43  ;;  %v638_v42 = vld [vmem:[%s5305_s1 + $0xff0] sm:$0xff]  ;;  %v81_v43 = vld [vmem:[%s5306_s0 + $0x1e8] sm:$0xff] }
  0xf6   :  { %2752 = vmatpush3.msra.mxu0 %v521_v44  ;;  %2793 = vmatpush3.msra.mxu1 %v553_v45  ;;  %v590_v44 = vld [vmem:[%s5305_s1 + $0xe70] sm:$0xff] }
  0xf7   :  { %2753 = vmatprep.subr.mxu0 %v536_v46  ;;  %2794 = vmatprep.subr.mxu1 %v568_v47  ;;  %v622_v45 = vld [vmem:[%s5305_s1 + $0xf70] sm:$0xff]  ;;  %v80_v46 = vld [vmem:[%s5306_s0 + $0x1e0] sm:$0xff]  ;;  %v605_v47 = vld [vmem:[%s5305_s1 + $0xee8] sm:$0xff] }
  0xf8   :  { %2754 = vmatpush3.msra.mxu0 %v520_v48  ;;  %2795 = vmatpush3.msra.mxu1 %v552_v49  ;;  %v710_v57 = vpop.permute.xlu0 %709  ;;  %v637_v48 = vld [vmem:[%s5305_s1 + $0xfe8] sm:$0xff]  ;;  %v83_v49 = vld [vmem:[%s5306_s0 + $0x1f8] sm:$0xff] }
  0xf9   :  { %2755 = vmatprep.subr.mxu0 %v535_v50  ;;  %2796 = vmatprep.subr.mxu1 %v567_v51  ;;  %v789_v60 = vadd.f32 %v4411_v18, %v710_v57  ;;  %v589_v50 = vld [vmem:[%s5305_s1 + $0xe68] sm:$0xff]  ;;  %v620_v57 = vld [vmem:[%s5305_s1 + $0xf60] sm:$0xff] }
  0xfa   :  { %2756 = vmatpush3.msra.mxu0 %v519_v52  ;;  %2797 = vmatpush3.msra.mxu1 %v551_v53  ;;  %v621_v51 = vld [vmem:[%s5305_s1 + $0xf68] sm:$0xff]  ;;  %v82_v52 = vld [vmem:[%s5306_s0 + $0x1f0] sm:$0xff]  ;;  %v604_v53 = vld [vmem:[%s5305_s1 + $0xee0] sm:$0xff] }
  0xfb   :  { %2757 = vmatprep.subr.mxu0 %v534_v54  ;;  %2798 = vmatprep.subr.mxu1 %v566_v55  ;;  %v4543_v1 = vadd.f32 %v4425_v24, %v789_v60  ;;  %v528_v24 = vld [vmem:[%s5305_s1 + $0xc80] sm:$0xff]  ;;  %v117_v55 = vld [vmem:[%s5306_s0 + $0x308] sm:$0xff]  ;;  %v603_v60 = vld [vmem:[%s5305_s1 + $0xed8] sm:$0xff] }
  0xfc   :  { %2758 = vmatpush3.msra.mxu0 %v518_v56  ;;  %2799 = vmatpush3.msra.mxu1 %v550_v58  ;;  %v636_v54 = vld [vmem:[%s5305_s1 + $0xfe0] sm:$0xff] }
  0xfd   :  { %2759 = vmatprep.subr.mxu0 %v533_v59  ;;  %v2282_v4 = vpop.f32.mrf.mxu0  ;;  %2800 = vmatprep.subr.mxu1 %v565_v61  ;;  %v588_v56 = vld [vmem:[%s5305_s1 + $0xe60] sm:$0xff] }
  0xfe   :  { %2760 = vmatpush3.msra.mxu0 %v517_v62  ;;  %2801 = vmatpush3.msra.mxu1 %v549_v63  ;;  %v116_v59 = vld [vmem:[%s5306_s0 + $0x300] sm:$0xff]  ;;  %v635_v62 = vld [vmem:[%s5305_s1 + $0xfd8] sm:$0xff] }
  0xff   :  { %2761 = vmatprep.subr.mxu0 %v532_v0  ;;  %v2283_v9 = vpop.f32.mrf.mxu0  ;;  %2802 = vmatprep.subr.mxu1 %v564_v2  ;;  %v119_v63 = vld [vmem:[%s5306_s0 + $0x318] sm:$0xff] }
 0x100   :  { %2762 = vmatpush3.msra.mxu0 %v516_v3  ;;  %v4569_v12 = vadd.f32 %v2283_v9, %v2282_v4  ;;  %v2323_v13 = vpop.f32.mrf.mxu1  ;;  %2803 = vmatpush3.msra.mxu1 %v548_v5  ;;  %v587_v0 = vld [vmem:[%s5305_s1 + $0xe58] sm:$0xff]  ;;  %v118_v4 = vld [vmem:[%s5306_s0 + $0x310] sm:$0xff]  ;;  %v601_v9 = vld [vmem:[%s5305_s1 + $0xec8] sm:$0xff] }
 0x101   :  { %2763 = vmatprep.subr.mxu0 %v531_v6  ;;  %2804 = vmatprep.subr.mxu1 %v563_v7  ;;  %v619_v2 = vld [vmem:[%s5305_s1 + $0xf58] sm:$0xff]  ;;  %v602_v5 = vld [vmem:[%s5305_s1 + $0xed0] sm:$0xff] }
 0x102   :  { %2764 = vmatpush3.msra.mxu0 %v515_v8  ;;  %v2324_v18 = vpop.f32.mrf.mxu1  ;;  %2805 = vmatpush3.msra.mxu1 %v547_v10  ;;  %v634_v6 = vld [vmem:[%s5305_s1 + $0xfd0] sm:$0xff] }
 0x103   :  { %2765 = vmatprep.subr.mxu0 %v530_v11  ;;  %v2285_v21 = vpop.f32.mrf.mxu0  ;;  %v4589_v22 = vadd.f32 %v2324_v18, %v2323_v13  ;;  %2806 = vmatprep.subr.mxu1 %v562_v14  ;;  %v586_v7 = vld [vmem:[%s5305_s1 + $0xe50] sm:$0xff]  ;;  %v633_v11 = vld [vmem:[%s5305_s1 + $0xfc8] sm:$0xff] }
 0x104   :  { %2766 = vmatpush3.msra.mxu0 %v514_v15  ;;  %2807 = vmatpush3.msra.mxu1 %v546_v16  ;;  %v618_v8 = vld [vmem:[%s5305_s1 + $0xf50] sm:$0xff]  ;;  %v617_v14 = vld [vmem:[%s5305_s1 + $0xf48] sm:$0xff]  ;;  %v600_v15 = vld [vmem:[%s5305_s1 + $0xec0] sm:$0xff] }
 0x105   :  { %2767 = vmatprep.subr.mxu0 %v529_v17  ;;  %v2286_v27 = vpop.f32.mrf.mxu0  ;;  %2808 = vmatprep.subr.mxu1 %v561_v19  ;;  %v632_v16 = vld [vmem:[%s5305_s1 + $0xfc0] sm:$0xff] }
 0x106   :  { %2768 = vmatpush3.msra.mxu0 %v513_v20  ;;  %v4609_v30 = vadd.f32 %v2286_v27, %v2285_v21  ;;  %v2326_v31 = vpop.f32.mrf.mxu1  ;;  %2809 = vmatpush3.msra.mxu1 %v545_v23  ;;  %v584_v17 = vld [vmem:[%s5305_s1 + $0xe40] sm:$0xff]  ;;  %v599_v20 = vld [vmem:[%s5305_s1 + $0xeb8] sm:$0xff]  ;;  %v614_v27 = vld [vmem:[%s5305_s1 + $0xf30] sm:$0xff] }
 0x107   :  { %2769 = vmatprep.subr.mxu0 %v528_v24  ;;  %2810 = vmatprep.subr.mxu1 %v560_v25  ;;  %v616_v19 = vld [vmem:[%s5305_s1 + $0xf40] sm:$0xff]  ;;  %v631_v21 = vld [vmem:[%s5305_s1 + $0xfb8] sm:$0xff]  ;;  %v598_v24 = vld [vmem:[%s5305_s1 + $0xeb0] sm:$0xff] }
 0x108   :  { %2770 = vmatpush3.msra.mxu0 %v512_v26  ;;  %v2327_v36 = vpop.f32.mrf.mxu1  ;;  %1746 = vmatprep.mubr.f32.mxu0 %v45_v28  ;;  %v615_v23 = vld [vmem:[%s5305_s1 + $0xf38] sm:$0xff]  ;;  %v630_v25 = vld [vmem:[%s5305_s1 + $0xfb0] sm:$0xff]  ;;  %v597_v28 = vld [vmem:[%s5305_s1 + $0xea8] sm:$0xff] }
 0x109   :  { %2811 = vmatpush3.msra.mxu1 %v544_v29  ;;  %v4629_v39 = vadd.f32 %v2327_v36, %v2326_v31  ;;  %1747 = vmatmul.mubr.f32.vlgmr.msra.gmra.mxu0 %v44_v32  ;;  %v582_v26 = vld [vmem:[%s5305_s1 + $0xe30] sm:$0xff]  ;;  %v629_v29 = vld [vmem:[%s5305_s1 + $0xfa8] sm:$0xff]  ;;  %v596_v32 = vld [vmem:[%s5305_s1 + $0xea0] sm:$0xff] }
 0x10a   :  { %1826 = vmatprep.mubr.f32.mxu1 %v47_v33  ;;  %2821 = vmatprep.subr.mxu0 %v607_v34  ;;  %v613_v31 = vld [vmem:[%s5305_s1 + $0xf28] sm:$0xff]  ;;  %v628_v33 = vld [vmem:[%s5305_s1 + $0xfa0] sm:$0xff]  ;;  %v595_v36 = vld [vmem:[%s5305_s1 + $0xe98] sm:$0xff] }
 0x10b   :  { %2862 = vmatprep.subr.mxu1 %v639_v35  ;;  %1827 = vmatmul.mubr.f32.vlgmr.msra.gmra.mxu1 %v46_v37  ;;  %v580_v34 = vld [vmem:[%s5305_s1 + $0xe20] sm:$0xff]  ;;  %v627_v37 = vld [vmem:[%s5305_s1 + $0xf98] sm:$0xff] }
 0x10c   :  { %2822 = vmatpush3.msra.mxu0 %v591_v38  ;;  %2863 = vmatpush3.msra.mxu1 %v623_v40  ;;  %v612_v35 = vld [vmem:[%s5305_s1 + $0xf20] sm:$0xff]  ;;  %v579_v38 = vld [vmem:[%s5305_s1 + $0xe18] sm:$0xff]  ;;  %v594_v40 = vld [vmem:[%s5305_s1 + $0xe90] sm:$0xff] }
 0x10d   :  { %2823 = vmatprep.subr.mxu0 %v606_v41  ;;  %2864 = vmatprep.subr.mxu1 %v638_v42  ;;  %v626_v41 = vld [vmem:[%s5305_s1 + $0xf90] sm:$0xff] }
 0x10e   :  { %1751 = vmatprep.mubr.f32.mxu0 %v81_v43  ;;  %2824 = vmatpush3.msra.mxu0 %v590_v44  ;;  %v578_v42 = vld [vmem:[%s5305_s1 + $0xe10] sm:$0xff]  ;;  %v593_v44 = vld [vmem:[%s5305_s1 + $0xe88] sm:$0xff] }
 0x10f   :  { %2865 = vmatpush3.msra.mxu1 %v622_v45  ;;  %1752 = vmatmul.mubr.f32.gmra.mxu0 %v80_v46  ;;  %v610_v43 = vld [vmem:[%s5305_s1 + $0xf10] sm:$0xff]  ;;  %v625_v45 = vld [vmem:[%s5305_s1 + $0xf88] sm:$0xff] }
 0x110   :  { %2825 = vmatprep.subr.mxu0 %v605_v47  ;;  %2866 = vmatprep.subr.mxu1 %v637_v48  ;;  %v577_v46 = vld [vmem:[%s5305_s1 + $0xe08] sm:$0xff]  ;;  %v592_v48 = vld [vmem:[%s5305_s1 + $0xe80] sm:$0xff] }
 0x111   :  { %1831 = vmatprep.mubr.f32.mxu1 %v83_v49  ;;  %2826 = vmatpush3.msra.mxu0 %v589_v50  ;;  %v715_v58 = vpop.permute.xlu0 %714  ;;  %v609_v47 = vld [vmem:[%s5305_s1 + $0xf08] sm:$0xff]  ;;  %v624_v49 = vld [vmem:[%s5305_s1 + $0xf80] sm:$0xff] }
 0x112   :  { %2867 = vmatpush3.msra.mxu1 %v621_v51  ;;  %2827 = vmatprep.subr.mxu0 %v604_v53  ;;  %v794_v61 = vadd.f32 %v4569_v12, %v715_v58  ;;  %v585_v12 = vld [vmem:[%s5305_s1 + $0xe48] sm:$0xff]  ;;  %v576_v50 = vld [vmem:[%s5305_s1 + $0xe00] sm:$0xff]  ;;  %v655_v58 = vld [vmem:[%s5305_s1 + $0x1078] sm:$0xff] }
 0x113   :  { %1832 = vmatmul.mubr.f32.gmra.mxu1 %v82_v52  ;;  %2868 = vmatprep.subr.mxu1 %v636_v54  ;;  %v49_v51 = vld [vmem:[%s5306_s0 + $0xe8] sm:$0xff]  ;;  %v608_v52 = vld [vmem:[%s5305_s1 + $0xf00] sm:$0xff]  ;;  %v51_v54 = vld [vmem:[%s5306_s0 + $0xf8] sm:$0xff] }
 0x114   :  { %1756 = vmatprep.mubr.f32.mxu0 %v117_v55  ;;  %2828 = vmatpush3.msra.mxu0 %v588_v56  ;;  %v4705_v3 = vadd.f32 %v4589_v22, %v794_v61  ;;  %v583_v22 = vld [vmem:[%s5305_s1 + $0xe38] sm:$0xff]  ;;  %v48_v53 = vld [vmem:[%s5306_s0 + $0xe0] sm:$0xff]  ;;  %v702_v61 = vld [vmem:[%s5305_s1 + $0x11f0] sm:$0xff] }
 0x115   :  { %2869 = vmatpush3.msra.mxu1 %v620_v57  ;;  %1757 = vmatmul.mubr.f32.gmra.mxu0 %v116_v59  ;;  %v671_v55 = vld [vmem:[%s5305_s1 + $0x10f8] sm:$0xff]  ;;  %v50_v57 = vld [vmem:[%s5306_s0 + $0xf0] sm:$0xff] }
 0x116   :  { %2829 = vmatprep.subr.mxu0 %v603_v60  ;;  %2870 = vmatprep.subr.mxu1 %v635_v62  ;;  %v703_v56 = vld [vmem:[%s5305_s1 + $0x11f8] sm:$0xff]  ;;  %v670_v60 = vld [vmem:[%s5305_s1 + $0x10f0] sm:$0xff]  ;;  %v85_v62 = vld [vmem:[%s5306_s0 + $0x208] sm:$0xff] }
 0x117   :  { %1836 = vmatprep.mubr.f32.mxu1 %v119_v63  ;;  %2830 = vmatpush3.msra.mxu0 %v587_v0  ;;  %v687_v59 = vld [vmem:[%s5305_s1 + $0x1178] sm:$0xff]  ;;  %v654_v63 = vld [vmem:[%s5305_s1 + $0x1070] sm:$0xff] }
 0x118   :  { %2871 = vmatpush3.msra.mxu1 %v619_v2  ;;  %v720_v10 = vpop.permute.xlu1 %719  ;;  %2831 = vmatprep.subr.mxu0 %v602_v5  ;;  %v686_v0 = vld [vmem:[%s5305_s1 + $0x1170] sm:$0xff]  ;;  %v84_v2 = vld [vmem:[%s5306_s0 + $0x200] sm:$0xff]  ;;  %v701_v5 = vld [vmem:[%s5305_s1 + $0x11e8] sm:$0xff] }
 0x119   :  { %1837 = vmatmul.mubr.f32.gmra.mxu1 %v118_v4  ;;  %v799_v13 = vadd.f32 %v4609_v30, %v720_v10  ;;  %2872 = vmatprep.subr.mxu1 %v634_v6  ;;  %v581_v30 = vld [vmem:[%s5305_s1 + $0xe28] sm:$0xff]  ;;  %v87_v6 = vld [vmem:[%s5306_s0 + $0x218] sm:$0xff]  ;;  %v668_v10 = vld [vmem:[%s5305_s1 + $0x10e0] sm:$0xff] }
 0x11a   :  { %2832 = vmatpush3.msra.mxu0 %v586_v7  ;;  %2873 = vmatpush3.msra.mxu1 %v618_v8  ;;  %v669_v4 = vld [vmem:[%s5305_s1 + $0x10e8] sm:$0xff] }
 0x11b   :  { %2833 = vmatprep.subr.mxu0 %v601_v9  ;;  %v4745_v18 = vadd.f32 %v4629_v39, %v799_v13  ;;  %2874 = vmatprep.subr.mxu1 %v633_v11  ;;  %v611_v39 = vld [vmem:[%s5305_s1 + $0xf18] sm:$0xff]  ;;  %v653_v7 = vld [vmem:[%s5305_s1 + $0x1068] sm:$0xff]  ;;  %v86_v9 = vld [vmem:[%s5306_s0 + $0x210] sm:$0xff] }
 0x11c   :  { %2834 = vmatpush3.msra.mxu0 %v585_v12  ;;  %2875 = vmatpush3.msra.mxu1 %v617_v14  ;;  %v685_v8 = vld [vmem:[%s5305_s1 + $0x1168] sm:$0xff]  ;;  %v700_v11 = vld [vmem:[%s5305_s1 + $0x11e0] sm:$0xff] }
 0x11d   :  { %2835 = vmatprep.subr.mxu0 %v600_v15  ;;  %2876 = vmatprep.subr.mxu1 %v632_v16  ;;  %v121_v12 = vld [vmem:[%s5306_s0 + $0x328] sm:$0xff]  ;;  %v652_v13 = vld [vmem:[%s5305_s1 + $0x1060] sm:$0xff]  ;;  %v667_v16 = vld [vmem:[%s5305_s1 + $0x10d8] sm:$0xff] }
 0x11e   :  { %2836 = vmatpush3.msra.mxu0 %v584_v17  ;;  %2877 = vmatpush3.msra.mxu1 %v616_v19  ;;  %v684_v14 = vld [vmem:[%s5305_s1 + $0x1160] sm:$0xff]  ;;  %v699_v17 = vld [vmem:[%s5305_s1 + $0x11d8] sm:$0xff] }
 0x11f   :  { %2837 = vmatprep.subr.mxu0 %v599_v20  ;;  %2878 = vmatprep.subr.mxu1 %v631_v21  ;;  %v120_v15 = vld [vmem:[%s5306_s0 + $0x320] sm:$0xff]  ;;  %v123_v19 = vld [vmem:[%s5306_s0 + $0x338] sm:$0xff] }
 0x120   :  { %2838 = vmatpush3.msra.mxu0 %v583_v22  ;;  %2879 = vmatpush3.msra.mxu1 %v615_v23  ;;  %v651_v20 = vld [vmem:[%s5305_s1 + $0x1058] sm:$0xff]  ;;  %v122_v22 = vld [vmem:[%s5306_s0 + $0x330] sm:$0xff] }
 0x121   :  { %2839 = vmatprep.subr.mxu0 %v598_v24  ;;  %2880 = vmatprep.subr.mxu1 %v630_v25  ;;  %v683_v21 = vld [vmem:[%s5305_s1 + $0x1158] sm:$0xff]  ;;  %v666_v23 = vld [vmem:[%s5305_s1 + $0x10d0] sm:$0xff] }
 0x122   :  { %2840 = vmatpush3.msra.mxu0 %v582_v26  ;;  %2881 = vmatpush3.msra.mxu1 %v614_v27  ;;  %v698_v24 = vld [vmem:[%s5305_s1 + $0x11d0] sm:$0xff]  ;;  %v665_v27 = vld [vmem:[%s5305_s1 + $0x10c8] sm:$0xff] }
 0x123   :  { %2841 = vmatprep.subr.mxu0 %v597_v28  ;;  %2882 = vmatprep.subr.mxu1 %v629_v29  ;;  %v650_v25 = vld [vmem:[%s5305_s1 + $0x1050] sm:$0xff]  ;;  %v697_v28 = vld [vmem:[%s5305_s1 + $0x11c8] sm:$0xff] }
 0x124   :  { %2842 = vmatpush3.msra.mxu0 %v581_v30  ;;  %2883 = vmatpush3.msra.mxu1 %v613_v31  ;;  %v682_v26 = vld [vmem:[%s5305_s1 + $0x1150] sm:$0xff]  ;;  %v649_v29 = vld [vmem:[%s5305_s1 + $0x1048] sm:$0xff]  ;;  %v664_v31 = vld [vmem:[%s5305_s1 + $0x10c0] sm:$0xff] }
 0x125   :  { %2843 = vmatprep.subr.mxu0 %v596_v32  ;;  %2884 = vmatprep.subr.mxu1 %v628_v33  ;;  %v681_v30 = vld [vmem:[%s5305_s1 + $0x1148] sm:$0xff]  ;;  %v696_v32 = vld [vmem:[%s5305_s1 + $0x11c0] sm:$0xff] }
 0x126   :  { %2844 = vmatpush3.msra.mxu0 %v580_v34  ;;  %2885 = vmatpush3.msra.mxu1 %v612_v35  ;;  %v648_v33 = vld [vmem:[%s5305_s1 + $0x1040] sm:$0xff]  ;;  %v663_v35 = vld [vmem:[%s5305_s1 + $0x10b8] sm:$0xff] }
 0x127   :  { %2845 = vmatprep.subr.mxu0 %v595_v36  ;;  %2886 = vmatprep.subr.mxu1 %v627_v37  ;;  %v680_v34 = vld [vmem:[%s5305_s1 + $0x1140] sm:$0xff]  ;;  %v695_v36 = vld [vmem:[%s5305_s1 + $0x11b8] sm:$0xff] }
 0x128   :  { %2846 = vmatpush3.msra.mxu0 %v579_v38  ;;  %2887 = vmatpush3.msra.mxu1 %v611_v39  ;;  %v647_v37 = vld [vmem:[%s5305_s1 + $0x1038] sm:$0xff]  ;;  %v662_v39 = vld [vmem:[%s5305_s1 + $0x10b0] sm:$0xff] }
 0x129   :  { %2847 = vmatprep.subr.mxu0 %v594_v40  ;;  %2888 = vmatprep.subr.mxu1 %v626_v41  ;;  %v679_v38 = vld [vmem:[%s5305_s1 + $0x1138] sm:$0xff]  ;;  %v694_v40 = vld [vmem:[%s5305_s1 + $0x11b0] sm:$0xff] }
 0x12a   :  { %2848 = vmatpush3.msra.mxu0 %v578_v42  ;;  %2889 = vmatpush3.msra.mxu1 %v610_v43  ;;  %v646_v41 = vld [vmem:[%s5305_s1 + $0x1030] sm:$0xff]  ;;  %v661_v43 = vld [vmem:[%s5305_s1 + $0x10a8] sm:$0xff] }
 0x12b   :  { %2849 = vmatprep.subr.mxu0 %v593_v44  ;;  %2890 = vmatprep.subr.mxu1 %v625_v45  ;;  %v678_v42 = vld [vmem:[%s5305_s1 + $0x1130] sm:$0xff]  ;;  %v693_v44 = vld [vmem:[%s5305_s1 + $0x11a8] sm:$0xff] }
 0x12c   :  { %2850 = vmatpush3.msra.mxu0 %v577_v46  ;;  %2891 = vmatpush3.msra.mxu1 %v609_v47  ;;  %v645_v45 = vld [vmem:[%s5305_s1 + $0x1028] sm:$0xff]  ;;  %v660_v47 = vld [vmem:[%s5305_s1 + $0x10a0] sm:$0xff] }
 0x12d   :  { %2851 = vmatprep.subr.mxu0 %v592_v48  ;;  %2892 = vmatprep.subr.mxu1 %v624_v49  ;;  %v677_v46 = vld [vmem:[%s5305_s1 + $0x1128] sm:$0xff]  ;;  %v692_v48 = vld [vmem:[%s5305_s1 + $0x11a0] sm:$0xff] }
 0x12e   :  { %2852 = vmatpush3.msra.mxu0 %v576_v50  ;;  %1906 = vmatprep.mubr.f32.mxu0 %v49_v51  ;;  %v644_v49 = vld [vmem:[%s5305_s1 + $0x1020] sm:$0xff]  ;;  %v659_v51 = vld [vmem:[%s5305_s1 + $0x1098] sm:$0xff] }
 0x12f   :  { %2893 = vmatpush3.msra.mxu1 %v608_v52  ;;  %1907 = vmatmul.mubr.f32.vlgmr.msra.gmra.mxu0 %v48_v53  ;;  %v676_v50 = vld [vmem:[%s5305_s1 + $0x1120] sm:$0xff]  ;;  %v691_v52 = vld [vmem:[%s5305_s1 + $0x1198] sm:$0xff] }
 0x130   :  { %1986 = vmatprep.mubr.f32.mxu1 %v51_v54  ;;  %2903 = vmatprep.subr.mxu0 %v671_v55  ;;  %v643_v53 = vld [vmem:[%s5305_s1 + $0x1018] sm:$0xff]  ;;  %v658_v55 = vld [vmem:[%s5305_s1 + $0x1090] sm:$0xff] }
 0x131   :  { %2944 = vmatprep.subr.mxu1 %v703_v56  ;;  %1987 = vmatmul.mubr.f32.vlgmr.msra.gmra.mxu1 %v50_v57  ;;  %v675_v54 = vld [vmem:[%s5305_s1 + $0x1118] sm:$0xff]  ;;  %v690_v56 = vld [vmem:[%s5305_s1 + $0x1190] sm:$0xff] }
 0x132   :  { %2904 = vmatpush3.msra.mxu0 %v655_v58  ;;  %2945 = vmatpush3.msra.mxu1 %v687_v59  ;;  %v642_v57 = vld [vmem:[%s5305_s1 + $0x1010] sm:$0xff]  ;;  %v657_v59 = vld [vmem:[%s5305_s1 + $0x1088] sm:$0xff] }
 0x133   :  { %2905 = vmatprep.subr.mxu0 %v670_v60  ;;  %2946 = vmatprep.subr.mxu1 %v702_v61  ;;  %v674_v58 = vld [vmem:[%s5305_s1 + $0x1110] sm:$0xff]  ;;  %v689_v60 = vld [vmem:[%s5305_s1 + $0x1188] sm:$0xff] }
 0x134   :  { %1911 = vmatprep.mubr.f32.mxu0 %v85_v62  ;;  %2906 = vmatpush3.msra.mxu0 %v654_v63  ;;  %v641_v61 = vld [vmem:[%s5305_s1 + $0x1008] sm:$0xff]  ;;  %v656_v63 = vld [vmem:[%s5305_s1 + $0x1080] sm:$0xff] }
 0x135   :  { %2947 = vmatpush3.msra.mxu1 %v686_v0  ;;  %1912 = vmatmul.mubr.f32.gmra.mxu0 %v84_v2  ;;  %v673_v62 = vld [vmem:[%s5305_s1 + $0x1108] sm:$0xff]  ;;  %v688_v0 = vld [vmem:[%s5305_s1 + $0x1180] sm:$0xff] }
 0x136   :  { %2907 = vmatprep.subr.mxu0 %v669_v4  ;;  %2948 = vmatprep.subr.mxu1 %v701_v5  ;;  %v640_v2 = vld [vmem:[%s5305_s1 + $0x1000] sm:$0xff]  ;;  %v53_v4 = vld [vmem:[%s5306_s0 + $0x108] sm:$0xff] }
 0x137   :  { %1991 = vmatprep.mubr.f32.mxu1 %v87_v6  ;;  %2908 = vmatpush3.msra.mxu0 %v653_v7  ;;  %v672_v5 = vld [vmem:[%s5305_s1 + $0x1100] sm:$0xff]  ;;  %v55_v6 = vld [vmem:[%s5306_s0 + $0x118] sm:$0xff] }
 0x138   :  { %2949 = vmatpush3.msra.mxu1 %v685_v8  ;;  %2909 = vmatprep.subr.mxu0 %v668_v10  ;;  %v52_v7 = vld [vmem:[%s5306_s0 + $0x100] sm:$0xff]  ;;  %v54_v8 = vld [vmem:[%s5306_s0 + $0x110] sm:$0xff]  ;;  %v91_v10 = vld [vmem:[%s5306_s0 + $0x238] sm:$0xff] }
 0x139   :  { %1992 = vmatmul.mubr.f32.gmra.mxu1 %v86_v9  ;;  %2950 = vmatprep.subr.mxu1 %v700_v11  ;;  %v89_v9 = vld [vmem:[%s5306_s0 + $0x228] sm:$0xff]  ;;  %v88_v11 = vld [vmem:[%s5306_s0 + $0x220] sm:$0xff] }
 0x13a   :  { %1916 = vmatprep.mubr.f32.mxu0 %v121_v12  ;;  %2910 = vmatpush3.msra.mxu0 %v652_v13  ;;  %v90_v12 = vld [vmem:[%s5306_s0 + $0x230] sm:$0xff]  ;;  %v125_v13 = vld [vmem:[%s5306_s0 + $0x348] sm:$0xff] }
 0x13b   :  { %2951 = vmatpush3.msra.mxu1 %v684_v14  ;;  %1917 = vmatmul.mubr.f32.gmra.mxu0 %v120_v15  ;;  %v127_v14 = vld [vmem:[%s5306_s0 + $0x358] sm:$0xff]  ;;  %v124_v15 = vld [vmem:[%s5306_s0 + $0x340] sm:$0xff] }
 0x13c   :  { %2911 = vmatprep.subr.mxu0 %v667_v16  ;;  %2952 = vmatprep.subr.mxu1 %v699_v17  ;;  %v126_v16 = vld [vmem:[%s5306_s0 + $0x350] sm:$0xff]  ;;  %v2361_v17 = vpop.f32.mrf.mxu0 }
 0x13d   :  { %1996 = vmatprep.mubr.f32.mxu1 %v123_v19  ;;  %2912 = vmatpush3.msra.mxu0 %v651_v20  ;;  %v5110_v19 = vpop.f32.mrf.mxu1 }
 0x13e   :  { %2953 = vmatpush3.msra.mxu1 %v683_v21  ;;  %2913 = vmatprep.subr.mxu0 %v666_v23  ;;  %v2362_v20 = vpop.f32.mrf.mxu0 }
 0x13f   :  { %1997 = vmatmul.mubr.f32.gmra.mxu1 %v122_v22  ;;  %2954 = vmatprep.subr.mxu1 %v698_v24  ;;  %v5112_v21 = vpop.f32.mrf.mxu1 }
 0x140   :  { %2914 = vmatpush3.msra.mxu0 %v650_v25  ;;  %2955 = vmatpush3.msra.mxu1 %v682_v26  ;;  %v2364_v22 = vpop.f32.mrf.mxu0 }
 0x141   :  { %2915 = vmatprep.subr.mxu0 %v665_v27  ;;  %2956 = vmatprep.subr.mxu1 %v697_v28  ;;  %v5114_v23 = vpop.f32.mrf.mxu1 }
 0x142   :  { %2916 = vmatpush3.msra.mxu0 %v649_v29  ;;  %2957 = vmatpush3.msra.mxu1 %v681_v30  ;;  %v2365_v24 = vpop.f32.mrf.mxu0 }
 0x143   :  { %2917 = vmatprep.subr.mxu0 %v664_v31  ;;  %2958 = vmatprep.subr.mxu1 %v696_v32  ;;  %v5116_v25 = vpop.f32.mrf.mxu1 }
 0x144   :  { %2918 = vmatpush3.msra.mxu0 %v648_v33  ;;  %2959 = vmatpush3.msra.mxu1 %v680_v34  ;;  %v5118_v26 = vpop.f32.mrf.mxu0 }
 0x145   :  { %2919 = vmatprep.subr.mxu0 %v663_v35  ;;  %2960 = vmatprep.subr.mxu1 %v695_v36  ;;  %v5120_v27 = vpop.f32.mrf.mxu1 }
 0x146   :  { %2920 = vmatpush3.msra.mxu0 %v647_v37  ;;  %2961 = vmatpush3.msra.mxu1 %v679_v38  ;;  %v5122_v28 = vpop.f32.mrf.mxu0 }
 0x147   :  { %2921 = vmatprep.subr.mxu0 %v662_v39  ;;  %2962 = vmatprep.subr.mxu1 %v694_v40  ;;  %v5124_v29 = vpop.f32.mrf.mxu1 }
 0x148   :  { %2922 = vmatpush3.msra.mxu0 %v646_v41  ;;  %2963 = vmatpush3.msra.mxu1 %v678_v42  ;;  %v2443_v30 = vpop.f32.mrf.mxu0 }
 0x149   :  { %2923 = vmatprep.subr.mxu0 %v661_v43  ;;  %2964 = vmatprep.subr.mxu1 %v693_v44  ;;  %v5126_v31 = vpop.f32.mrf.mxu1 }
 0x14a   :  { %2924 = vmatpush3.msra.mxu0 %v645_v45  ;;  %2965 = vmatpush3.msra.mxu1 %v677_v46  ;;  %v2444_v32 = vpop.f32.mrf.mxu0 }
 0x14b   :  { %2925 = vmatprep.subr.mxu0 %v660_v47  ;;  %2966 = vmatprep.subr.mxu1 %v692_v48  ;;  %v5128_v33 = vpop.f32.mrf.mxu1 }
 0x14c   :  { %2926 = vmatpush3.msra.mxu0 %v644_v49  ;;  %2967 = vmatpush3.msra.mxu1 %v676_v50  ;;  %v2446_v34 = vpop.f32.mrf.mxu0 }
 0x14d   :  { %2927 = vmatprep.subr.mxu0 %v659_v51  ;;  %2968 = vmatprep.subr.mxu1 %v691_v52  ;;  %v5130_v35 = vpop.f32.mrf.mxu1 }
 0x14e   :  { %2928 = vmatpush3.msra.mxu0 %v643_v53  ;;  %2969 = vmatpush3.msra.mxu1 %v675_v54  ;;  %v2447_v36 = vpop.f32.mrf.mxu0 }
 0x14f   :  { %2929 = vmatprep.subr.mxu0 %v658_v55  ;;  %2970 = vmatprep.subr.mxu1 %v690_v56  ;;  %v5132_v37 = vpop.f32.mrf.mxu1 }
 0x150   :  { %2930 = vmatpush3.msra.mxu0 %v642_v57  ;;  %2971 = vmatpush3.msra.mxu1 %v674_v58  ;;  %v5134_v38 = vpop.f32.mrf.mxu0 }
 0x151   :  { %2931 = vmatprep.subr.mxu0 %v657_v59  ;;  %2972 = vmatprep.subr.mxu1 %v689_v60  ;;  %v5136_v39 = vpop.f32.mrf.mxu1 }
 0x152   :  { %2932 = vmatpush3.msra.mxu0 %v641_v61  ;;  %2973 = vmatpush3.msra.mxu1 %v673_v62  ;;  %v5138_v40 = vpop.f32.mrf.mxu0 }
 0x153   :  { %2933 = vmatprep.subr.mxu0 %v656_v63  ;;  %2974 = vmatprep.subr.mxu1 %v688_v0  ;;  %v5140_v41 = vpop.f32.mrf.mxu1 }
 0x154   :  { %2934 = vmatpush3.msra.mxu0 %v640_v2  ;;  %2066 = vmatprep.mubr.f32.mxu0 %v53_v4 }
 0x155   :  { %2975 = vmatpush3.msra.mxu1 %v672_v5  ;;  %2146 = vmatprep.mubr.f32.mxu1 %v55_v6 }
 0x156   :  { %2067 = vmatmul.mubr.f32.vlgmr.msra.gmra.mxu0 %v52_v7  ;;  %2147 = vmatmul.mubr.f32.vlgmr.msra.gmra.mxu1 %v54_v8 }
 0x157   :  { %2071 = vmatprep.mubr.f32.mxu0 %v89_v9  ;;  %2151 = vmatprep.mubr.f32.mxu1 %v91_v10  ;;  %v2525_v42 = vpop.f32.mrf.mxu0 }
 0x159   :  { %v5142_v43 = vpop.f32.mrf.mxu1  ;;  %v2526_v44 = vpop.f32.mrf.mxu0 }
 0x15a   :  { %2072 = vmatmul.mubr.f32.gmra.mxu0 %v88_v11  ;;  %2152 = vmatmul.mubr.f32.gmra.mxu1 %v90_v12 }
 0x15b   :  { %2076 = vmatprep.mubr.f32.mxu0 %v125_v13  ;;  %2156 = vmatprep.mubr.f32.mxu1 %v127_v14  ;;  %v5144_v45 = vpop.f32.mrf.mxu1 }
 0x15d   :  { %v2528_v46 = vpop.f32.mrf.mxu0 }
 0x15e   :  { %2077 = vmatmul.mubr.f32.gmra.mxu0 %v124_v15  ;;  %2157 = vmatmul.mubr.f32.gmra.mxu1 %v126_v16 }
 0x15f   :  { %v2529_v48 = vpop.f32.mrf.mxu0 }
 0x161   :  { %v5146_v47 = vpop.f32.mrf.mxu1 }
 0x163   :  { %v5148_v49 = vpop.f32.mrf.mxu1  ;;  %v5150_v50 = vpop.f32.mrf.mxu0 }
 0x165   :  { %v5154_v52 = vpop.f32.mrf.mxu0 }
 0x167   :  { %v5152_v51 = vpop.f32.mrf.mxu1 }
 0x169   :  { %v5156_v53 = vpop.f32.mrf.mxu1 }
 0x17d   :  { %v2607_v54 = vpop.f32.mrf.mxu0 }
 0x17f   :  { %v5158_v55 = vpop.f32.mrf.mxu1  ;;  %v2608_v56 = vpop.f32.mrf.mxu0 }
 0x181   :  { %v5160_v57 = vpop.f32.mrf.mxu1 }
 0x183   :  { %v5162_v58 = vpop.f32.mrf.mxu0 }
 0x185   :  { %v5166_v60 = vpop.f32.mrf.mxu0 }
 0x187   :  { %v5164_v59 = vpop.f32.mrf.mxu1 }
 0x189   :  { %v5168_v61 = vpop.f32.mrf.mxu1  ;;  %v5170_v62 = vpop.f32.mrf.mxu0 }
 0x18b   :  { %v5174_v0 = vpop.f32.mrf.mxu0 }
 0x18d   :  { %v5172_v63 = vpop.f32.mrf.mxu1 }
 0x18e   :  { %5311 = vst [vmem:[#allocation2_spill] sm:$0xff] %v5172_v63  ;;  %v2363_v63 = vadd.f32 %v2362_v20, %v2361_v17  ;;  %v2407_v17 = vadd.f32 %v5116_v25, %v5114_v23  ;;  %v2489_v25 = vadd.f32 %v5132_v37, %v5130_v35  ;;  %v2492_v35 = vadd.f32 %v5140_v41, %v5136_v39 }
 0x18f   :  { %v5176_v2 = vpop.f32.mrf.mxu1  ;;  %v2609_v37 = vadd.f32 %v2608_v56, %v2607_v54  ;;  %v2650_v39 = vadd.f32 %v5160_v57, %v5158_v55 }
 0x190   :  { %5312 = vst [vmem:[#allocation3_spill] sm:$0xff] %v5176_v2 }
 0x1a3   :  { %v5178_v4 = vpop.f32.mrf.mxu0 }
 0x1a5   :  { %v5180_v5 = vpop.f32.mrf.mxu1  ;;  %v5182_v6 = vpop.f32.mrf.mxu0 }
 0x1a6   :  { %5313 = vst [vmem:[#allocation4_spill] sm:$0xff] %v5180_v5  ;;  %v2366_v5 = vadd.f32 %v2365_v24, %v2364_v22  ;;  %v2448_v22 = vadd.f32 %v2447_v36, %v2446_v34  ;;  %v2451_v34 = vadd.f32 %v5138_v40, %v5134_v38  ;;  %v2571_v38 = vadd.f32 %v5148_v49, %v5146_v47 }
 0x1a7   :  { %v5184_v7 = vpop.f32.mrf.mxu1  ;;  %v2574_v47 = vadd.f32 %v5156_v53, %v5152_v51  ;;  %v2691_v49 = vadd.f32 %v5182_v6, %v5178_v4 }
 0x1a8   :  { %5314 = vst [vmem:[#allocation5_spill] sm:$0xff] %v5184_v7 }
 0x1a9   :  { %v5186_v8 = vpop.f32.mrf.mxu0 }
 0x1ab   :  { %v5190_v10 = vpop.f32.mrf.mxu0 }
 0x1ac   :  { %5316 = vst [vmem:[#allocation7_spill] sm:$0xff] %v5190_v10 }
 0x1ad   :  { %v5188_v9 = vpop.f32.mrf.mxu1 }
 0x1ae   :  { %5315 = vst [vmem:[#allocation6_spill] sm:$0xff] %v5188_v9 }
 0x1af   :  { %v5192_v11 = vpop.f32.mrf.mxu1  ;;  %v5194_v12 = vpop.f32.mrf.mxu0  ;;  %v5325_v51 = vld [vmem:[#allocation5_spill] sm:$0xff] }
 0x1b0   :  { %5317 = vst [vmem:[#allocation8_spill] sm:$0xff] %v5192_v11  ;;  %5318 = vst [vmem:[#allocation9_spill] sm:$0xff] %v5194_v12  ;;  %v949_v11 = vadd.f32 %v2363_v63, %v4543_v1  ;;  %v2404_v12 = vadd.f32 %v5112_v21, %v5110_v19  ;;  %v2486_v19 = vadd.f32 %v5128_v33, %v5126_v31 }
 0x1b1   :  { %v5198_v14 = vpop.f32.mrf.mxu0  ;;  %v2527_v63 = vadd.f32 %v2526_v44, %v2525_v42  ;;  %v2530_v33 = vadd.f32 %v2529_v48, %v2528_v46  ;;  %v2533_v46 = vadd.f32 %v5154_v52, %v5150_v50  ;;  %v2653_v52 = vadd.f32 %v5168_v61, %v5164_v59 }
 0x1b2   :  { %5320 = vst [vmem:[#allocation11_spill] sm:$0xff] %v5198_v14  ;;  %v2445_v14 = vadd.f32 %v2444_v32, %v2443_v30  ;;  %v1029_v20 = vadd.f32 %v2404_v12, %v949_v11 }
 0x1b3   :  { %v5196_v13 = vpop.f32.mrf.mxu1  ;;  %v5323_v55 = vld [vmem:[#allocation7_spill] sm:$0xff] }
 0x1b4   :  { %5319 = vst [vmem:[#allocation10_spill] sm:$0xff] %v5196_v13  ;;  %v1109_v1 = vadd.f32 %v2445_v14, %v1029_v20  ;;  %v2694_v57 = vadd.f32 %v5323_v55, %v5186_v8 }
 0x1b5   :  { %v5200_v15 = vpop.f32.mrf.mxu1 }
 0x1b6   :  { %5321 = vst [vmem:[#allocation12_spill] sm:$0xff] %v5200_v15  ;;  %v954_v15 = vadd.f32 %v2366_v5, %v4705_v3  ;;  %v2410_v3 = vadd.f32 %v5124_v29, %v5120_v27 }
 0x1b8   :  { %v1034_v30 = vadd.f32 %v2407_v17, %v954_v15 }
 0x1ba   :  { %v1114_v23 = vadd.f32 %v2448_v22, %v1034_v30  ;;  %v5324_v22 = vld [vmem:[#allocation4_spill] sm:$0xff]  ;;  %v5327_v30 = vld [vmem:[#allocation3_spill] sm:$0xff] }
 0x1bb   :  { %v2732_v53 = vadd.f32 %v5325_v51, %v5324_v22 }
 0x1bc   :  { %v1194_v27 = vadd.f32 %v2489_v25, %v1114_v23  ;;  %v5330_v23 = vld [vmem:[#allocation9_spill] sm:$0xff]  ;;  %v5331_v25 = vld [vmem:[#allocation11_spill] sm:$0xff] }
 0x1c9   :  { %v5202_v16 = vpop.f32.mrf.mxu0 }
 0x1cb   :  { %v5204_v2 = vpop.f32.mrf.mxu1  ;;  %v5206_v7 = vpop.f32.mrf.mxu0 }
 0x1cc   :  { %v2773_v59 = vadd.f32 %v5206_v7, %v5202_v16  ;;  %v5333_v16 = vld [vmem:[#allocation10_spill] sm:$0xff] }
 0x1cd   :  { %v5208_v9 = vpop.f32.mrf.mxu1 }
 0x1ce   :  { %5322 = vst [vmem:[#allocation13_spill] sm:$0xff] %v5208_v9  ;;  %v2369_v9 = vadd.f32 %v5122_v28, %v5118_v26  ;;  %v1189_v28 = vadd.f32 %v2486_v19, %v1109_v1  ;;  %v5326_v19 = vld [vmem:[#allocation2_spill] sm:$0xff] }
 0x1cf   :  { %v5213_v13 = vpop.f32.mrf.mxu0 }
 0x1d0   :  { %v959_v32 = vadd.f32 %v2369_v9, %v4745_v18  ;;  %v1269_v5 = vadd.f32 %v2527_v63, %v1189_v28  ;;  %v2568_v18 = vadd.f32 %v5144_v45, %v5142_v43  ;;  %v1274_v9 = vadd.f32 %v2530_v33, %v1194_v27 }
 0x1d1   :  { %v2775_v24 = vpop.f32.mrf.mxu0  ;;  %v2612_v43 = vadd.f32 %v5166_v60, %v5162_v58  ;;  %v2615_v60 = vadd.f32 %v5174_v0, %v5170_v62  ;;  %v5328_v62 = vld [vmem:[#allocation6_spill] sm:$0xff]  ;;  %v5329_v0 = vld [vmem:[#allocation8_spill] sm:$0xff]  ;;  %v2697_v28 = vadd.f32 %v5331_v25, %v5330_v23 }
 0x1d2   :  { %v1039_v36 = vadd.f32 %v2410_v3, %v959_v32  ;;  %v1349_v11 = vadd.f32 %v2568_v18, %v1269_v5  ;;  %v1354_v41 = vadd.f32 %v2571_v38, %v1274_v9  ;;  %v2656_v32 = vadd.f32 %v5327_v30, %v5326_v19 }
 0x1d3   :  { %v5215_v10 = vpop.f32.mrf.mxu1  ;;  %v2735_v3 = vadd.f32 %v5329_v0, %v5328_v62  ;;  %v2776_v33 = vadd.f32 %v2775_v24, %v5213_v13 }
 0x1d4   :  { %v1119_v42 = vadd.f32 %v2451_v34, %v1039_v36  ;;  %v1429_v12 = vadd.f32 %v2609_v37, %v1349_v11  ;;  %v1434_v50 = vadd.f32 %v2612_v43, %v1354_v41  ;;  %v5334_v37 = vld [vmem:[#allocation12_spill] sm:$0xff] }
 0x1d5   :  { %v5224_v21 = vpop.f32.mrf.mxu1  ;;  %v5231_v26 = vpop.f32.mrf.mxu0  ;;  %v5332_v18 = vld [vmem:[#allocation13_spill] sm:$0xff]  ;;  %v2738_v9 = vadd.f32 %v5334_v37, %v5333_v16 }
 0x1d6   :  { %v1199_v45 = vadd.f32 %v2492_v35, %v1119_v42  ;;  %v1509_v58 = vadd.f32 %v2650_v39, %v1429_v12  ;;  %v1514_v4 = vadd.f32 %v2653_v52, %v1434_v50  ;;  %v2814_v27 = vadd.f32 %v5332_v18, %v5204_v2 }
 0x1d7   :  { %v2778_v29 = vpop.f32.mrf.mxu0  ;;  %v2817_v43 = vadd.f32 %v5224_v21, %v5215_v10 }
 0x1d8   :  { %v1279_v56 = vadd.f32 %v2533_v46, %v1199_v45  ;;  %v1589_v20 = vadd.f32 %v2691_v49, %v1509_v58  ;;  %v1594_v61 = vadd.f32 %v2694_v57, %v1514_v4  ;;  %v2779_v13 = vadd.f32 %v2778_v29, %v5231_v26 }
 0x1d9   :  { %v5235_v31 = vpop.f32.mrf.mxu1 }
 0x1da   :  { %v1359_v17 = vadd.f32 %v2574_v47, %v1279_v56  ;;  %v1669_v63 = vadd.f32 %v2732_v53, %v1589_v20  ;;  %v1674_v42 = vadd.f32 %v2735_v3, %v1594_v61 }
 0x1db   :  { %v2819_v44 = vpop.f32.mrf.mxu1 }
 0x1dc   :  { %v1439_v6 = vadd.f32 %v2615_v60, %v1359_v17  ;;  %v1749_v5 = vadd.f32 %v2773_v59, %v1669_v63  ;;  %v1754_v46 = vadd.f32 %v2776_v33, %v1674_v42  ;;  %v2820_v52 = vadd.f32 %v2819_v44, %v5235_v31 }
 0x1de   :  { %v1519_v36 = vadd.f32 %v2656_v32, %v1439_v6  ;;  %v1829_v45 = vadd.f32 %v2814_v27, %v1749_v5  ;;  %v1834_v47 = vadd.f32 %v2817_v43, %v1754_v46 }
 0x1e0   :  { %v1599_v7 = vadd.f32 %v2697_v28, %v1519_v36 }
 0x1e2   :  { %v1679_v39 = vadd.f32 %v2738_v9, %v1599_v7  ;;  %v2219_v9 = vld [vmem:[%s5308_s4] sm:$0xff] }
 0x1e4   :  { %v1759_v50 = vadd.f32 %v2779_v13, %v1679_v39 }
 0x1e6   :  { %v1839_v29 = vadd.f32 %v2820_v52, %v1759_v50  ;;  %v2221_v50 = vld [vmem:[%s5308_s4 + $0x10] sm:$0xff] }
 0x1ef   :  { %v2853_v40 = vpop.f32.mrf.mxu0 }
 0x1f1   :  { %v2894_v48 = vpop.f32.mrf.mxu1  ;;  %v2854_v54 = vpop.f32.mrf.mxu0 }
 0x1f2   :  { %v2855_v38 = vadd.f32 %v2854_v54, %v2853_v40 }
 0x1f3   :  { %v2895_v14 = vpop.f32.mrf.mxu1 }
 0x1f4   :  { %v1909_v41 = vadd.f32 %v2855_v38, %v1829_v45  ;;  %v2896_v2 = vadd.f32 %v2895_v14, %v2894_v48 }
 0x1f5   :  { %v2856_v15 = vpop.f32.mrf.mxu0 }
 0x1f6   :  { %v1989_v55 = vadd.f32 %v2896_v2, %v1909_v41  ;;  %v2195_v41 = vld [vmem:[%s5309_s3] sm:$0xff] }
 0x1f7   :  { %v2857_v8 = vpop.f32.mrf.mxu0 }
 0x1f8   :  { %v2858_v24 = vadd.f32 %v2857_v8, %v2856_v15 }
 0x1f9   :  { %v2897_v1 = vpop.f32.mrf.mxu1 }
 0x1fa   :  { %v1914_v54 = vadd.f32 %v2858_v24, %v1834_v47  ;;  %v2196_v47 = vld [vmem:[%s5309_s3 + $0x8] sm:$0xff] }
 0x1fb   :  { %v2898_v34 = vpop.f32.mrf.mxu1  ;;  %v2859_v35 = vpop.f32.mrf.mxu0 }
 0x1fc   :  { %v2899_v58 = vadd.f32 %v2898_v34, %v2897_v1 }
 0x1fd   :  { %v2860_v12 = vpop.f32.mrf.mxu0 }
 0x1fe   :  { %v2861_v10 = vadd.f32 %v2860_v12, %v2859_v35  ;;  %v1994_v48 = vadd.f32 %v2899_v58, %v1914_v54 }
 0x1ff   :  { %v2900_v11 = vpop.f32.mrf.mxu1 }
 0x200   :  { %v1919_v22 = vadd.f32 %v2861_v10, %v1839_v29 }
 0x201   :  { %v2901_v56 = vpop.f32.mrf.mxu1 }
 0x202   :  { %v2902_v51 = vadd.f32 %v2901_v56, %v2900_v11 }
 0x204   :  { %v1999_v59 = vadd.f32 %v2902_v51, %v1919_v22 }
 0x216   :  { %v2935_v49 = vpop.f32.mrf.mxu0  ;;  %v2976_v40 = vpop.f32.mrf.mxu1 }
 0x218   :  { %v2936_v60 = vpop.f32.mrf.mxu0  ;;  %v2977_v57 = vpop.f32.mrf.mxu1 }
 0x219   :  { %v2937_v21 = vadd.f32 %v2936_v60, %v2935_v49  ;;  %v2978_v17 = vadd.f32 %v2977_v57, %v2976_v40  ;;  %v2197_v40 = vld [vmem:[%s5309_s3 + $0x10] sm:$0xff]  ;;  %v2220_v60 = vld [vmem:[%s5308_s4 + $0x8] sm:$0xff] }
 0x21a   :  { %v2938_v26 = vpop.f32.mrf.mxu0  ;;  %v2979_v20 = vpop.f32.mrf.mxu1 }
 0x21b   :  { %v2069_v15 = vadd.f32 %v2937_v21, %v1989_v55 }
 0x21c   :  { %v2939_v14 = vpop.f32.mrf.mxu0  ;;  %v2980_v4 = vpop.f32.mrf.mxu1 }
 0x21d   :  { %v2940_v53 = vadd.f32 %v2939_v14, %v2938_v26  ;;  %v2149_v31 = vadd.f32 %v2978_v17, %v2069_v15  ;;  %v2981_v1 = vadd.f32 %v2980_v4, %v2979_v20 }
 0x21e   :  { %v2941_v44 = vpop.f32.mrf.mxu0  ;;  %v2982_v19 = vpop.f32.mrf.mxu1 }
 0x21f   :  { %v2074_v6 = vadd.f32 %v2940_v53, %v1994_v48  ;;  %v2162_v30 = vmax.f32 %v2149_v31, 0.0 }
 0x220   :  { %v2942_v32 = vpop.f32.mrf.mxu0  ;;  %v2983_v62 = vpop.f32.mrf.mxu1 }
 0x221   :  { %v2943_v61 = vadd.f32 %v2942_v32, %v2941_v44  ;;  %2165 = vadd.xlane.f32.xlu1 %v2162_v30  ;;  %v2154_v0 = vadd.f32 %v2981_v1, %v2074_v6  ;;  %v2984_v8 = vadd.f32 %v2983_v62, %v2982_v19 }
 0x223   :  { %v2079_v3 = vadd.f32 %v2943_v61, %v1999_v59  ;;  %v2163_v63 = vmax.f32 %v2154_v0, 0.0 }
 0x225   :  { %2167 = vadd.xlane.f32.xlu0 %v2163_v63  ;;  %v2159_v23 = vadd.f32 %v2984_v8, %v2079_v3 }
 0x227   :  { %v2164_v25 = vmax.f32 %v2159_v23, 0.0 }
 0x229   :  { %2169 = vadd.xlane.f32.xlu0 %v2164_v25 }
 0x2aa   :  { %v2166_v28 = vpop.xlane.xlu1 %2165 }
 0x2ab   :  { %v2171_v34 = vmul.f32 0.0078125, %v2166_v28 }
 0x2ad   :  { %v2174_v33 = vsub.f32 %v2162_v30, %v2171_v34 }
 0x2ae   :  { %v2168_v36 = vpop.xlane.xlu0 %2167 }
 0x2af   :  { %v2172_v5 = vmul.f32 0.0078125, %v2168_v36  ;;  %v2177_v18 = vmul.f32 %v2174_v33, %v2174_v33 }
 0x2b1   :  { %v2175_v27 = vsub.f32 %v2163_v63, %v2172_v5  ;;  %2180 = vadd.xlane.f32.xlu1 %v2177_v18 }
 0x2b2   :  { %v2170_v42 = vpop.xlane.xlu0 %2169 }
 0x2b3   :  { %v2173_v35 = vmul.f32 0.0078125, %v2170_v42  ;;  %v2178_v7 = vmul.f32 %v2175_v27, %v2175_v27 }
 0x2b5   :  { %v2176_v16 = vsub.f32 %v2164_v25, %v2173_v35  ;;  %2182 = vadd.xlane.f32.xlu0 %v2178_v7 }
 0x2b7   :  { %v2179_v37 = vmul.f32 %v2176_v16, %v2176_v16 }
 0x2b9   :  { %2184 = vadd.xlane.f32.xlu1 %v2179_v37 }
 0x2cb   :  { %2224 = vperm.xlu0 %2986, %v2219_v9  }
 0x33a   :  { %v2181_v38 = vpop.xlane.xlu1 %2180 }
 0x33b   :  { %v2186_v11 = vmul.f32 0.0078125, %v2181_v38 }
 0x33d   :  { %v2189_v46 = vadd.f32 1e-05, %v2186_v11 }
 0x33e   :  { %v2183_v43 = vpop.xlane.xlu0 %2182 }
 0x33f   :  { %2988 = vrsqrt.f32 %v2189_v46  ;;  %v2187_v45 = vmul.f32 0.0078125, %v2183_v43 }
 0x341   :  { %v2190_v13 = vadd.f32 1e-05, %v2187_v45 }
 0x342   :  { %v2185_v24 = vpop.xlane.xlu1 %2184 }
 0x343   :  { %2990 = vrsqrt.f32 %v2190_v13  ;;  %v2188_v12 = vmul.f32 0.0078125, %v2185_v24 }
 0x345   :  { %v2191_v39 = vadd.f32 1e-05, %v2188_v12 }
 0x346   :  { %v2225_v55 = vpop.permute.xlu0 %2224 }
 0x347   :  { %2992 = vrsqrt.f32 %v2191_v39 }
 0x34c   :  { %v2989_v2 = vpop.eup %2988 }
 0x34d   :  { %v2198_v56 = vmul.f32 %v2989_v2, %v2195_v41 }
 0x34f   :  { %2203 = vperm.xlu0 %2986, %v2198_v56  }
 0x350   :  { %v2991_v49 = vpop.eup %2990 }
 0x351   :  { %v2199_v52 = vmul.f32 %v2991_v49, %v2196_v47 }
 0x353   :  { %2208 = vperm.xlu1 %2987, %v2199_v52   ;;  %2234 = vperm.xlu0 %2986, %v2221_v50  }
 0x354   :  { %v2993_v54 = vpop.eup %2992 }
 0x355   :  { %v2200_v58 = vmul.f32 %v2993_v54, %v2197_v40 }
 0x357   :  { %2213 = vperm.xlu1 %2987, %v2200_v58  }
 0x35b   :  { %2229 = vperm.xlu1 %2987, %v2220_v60  }
 0x3ca   :  { %v2204_v10 = vpop.permute.xlu0 %2203 }
 0x3cb   :  { %v2216_v21 = vmul.f32 %v2204_v10, %v2174_v33 }
 0x3cd   :  { %v2237_v57 = vadd.f32 %v2225_v55, %v2216_v21 }
 0x3ce   :  { %v2209_v26 = vpop.permute.xlu1 %2208  ;;  %v2235_v17 = vpop.permute.xlu0 %2234 }
 0x3cf   :  { %2240 = vst [vmem:[%s5310_s5] sm:$0xff] %v2237_v57  ;;  %v2217_v20 = vmul.f32 %v2209_v26, %v2175_v27 }
 0x3d2   :  { %v2214_v29 = vpop.permute.xlu1 %2213 }
 0x3d3   :  { %v2218_v15 = vmul.f32 %v2214_v29, %v2176_v16 }
 0x3d5   :  { %v2239_v48 = vadd.f32 %v2235_v17, %v2218_v15 }
 0x3d6   :  { %v2230_v14 = vpop.permute.xlu1 %2229 }
 0x3d7   :  { %2242 = vst [vmem:[%s5310_s5 + $0x10] sm:$0xff] %v2239_v48  ;;  %v2238_v22 = vadd.f32 %v2230_v14, %v2217_v20 }
 0x3d9   :  { %2241 = vst [vmem:[%s5310_s5 + $0x8] sm:$0xff] %v2238_v22 }

</bundles_post_ra>
